<compile_context>
chip_gen: v7x
topology: tpu7x:2x2x1
jax: 0.10.0
libtpu: 0.0.40
codegen_flags: <defaults>
</compile_context>

<pallas_src>
import functools

import jax
import jax.numpy as jnp
from jax.experimental import pallas as pl
from jax.experimental.pallas import tpu as pltpu

_LANE = 128


def _round_up(v, m):
    return (v + m - 1) // m * m


def _compute_dtype(compute_dtype):
    if compute_dtype in (None, "float32"):
        return jnp.float32
    if compute_dtype == "bfloat16":
        return jnp.bfloat16
    raise ValueError(f"unsupported compute_dtype: {compute_dtype}")


def _make_snn_kernel(conv_order_down, conv_order_up, update_func,
                     compute_dtype, c_block):
    """Build the kernel body with static Chebyshev orders.

    Kernel args: x, [lap_down], [lap_up], w_flat, out, slab_scratch
      x:       (N, C_in_pad)
      lap_*:   (N, N)                     (only the ones actually used)
      w_flat:  (K*C_in_pad, C_out_pad)    (Chebyshev-order-major row blocks)
      out:     (N, C_out_pad)
      slab:    (N, K*C_in_pad) VMEM scratch
    """
    has_down = conv_order_down > 0
    has_up = conv_order_up > 0

    def kernel(*refs):
        i = 0
        x_ref = refs[i]; i += 1
        ld_ref = lu_ref = None
        if has_down:
            ld_ref = refs[i]; i += 1
        if has_up:
            lu_ref = refs[i]; i += 1
        w_ref = refs[i]; i += 1
        o_ref = refs[i]; i += 1
        slab_ref = refs[i]

        x = x_ref[...]
        # identity term -> slab column block 0
        slab_ref[:, 0:c_block] = x

        ld = ld_ref[...] if has_down else None
        lu = lu_ref[...] if has_up else None

        # Interleave the two independent Chebyshev recurrences
        # (X_k = L @ X_{k-1}) so the scheduler can overlap the two dependent
        # matmul chains and hide MXU result-path latency.
        cur_d = x
        cur_u = x
        for k in range(max(conv_order_down, conv_order_up)):
            if k < conv_order_down:
                cur_d = jnp.dot(ld, cur_d,
                                preferred_element_type=jnp.float32
                                ).astype(compute_dtype)
                col = (1 + k) * c_block
                slab_ref[:, col:col + c_block] = cur_d
            if k < conv_order_up:
                cur_u = jnp.dot(lu, cur_u,
                                preferred_element_type=jnp.float32
                                ).astype(compute_dtype)
                col = (1 + conv_order_down + k) * c_block
                slab_ref[:, col:col + c_block] = cur_u

        # Single fused, lane-dense weight contraction:
        # (N, K*C_in_pad) @ (K*C_in_pad, C_out_pad), accumulate in f32.
        # NOTE(v5e): if the vector-store slot (not MXU) ever binds, switch to
        # per-k accumulation (acc += cur_k @ W_k) instead of this slab round
        # trip — measure first.
        y = jnp.dot(slab_ref[...], w_ref[...],
                    preferred_element_type=jnp.float32)

        if update_func == "sigmoid":
            y = jax.nn.sigmoid(y)
        elif update_func == "relu":
            y = jnp.maximum(y, 0.0)
        # update_func in (None, 'id') -> identity

        o_ref[...] = y.astype(o_ref.dtype)

    return kernel


def prepare_snn_weight(weight, *, conv_order_down, conv_order_up,
                       compute_dtype="bfloat16"):
    """One-time parameter transform (do this at init, NOT per forward call).

    weight: (C_in, C_out, 1 + conv_order_down + conv_order_up)
    returns w_flat: (K * C_in_pad, C_out_pad) in the compute dtype, where
            row block k corresponds to weight[:, :, k] (channel dims padded
            with zeros to 128 lanes).
    """
    cdt = _compute_dtype(compute_dtype)
    c_in, c_out, k_total = weight.shape
    assert k_total == 1 + conv_order_down + conv_order_up
    c_in_pad = _round_up(c_in, _LANE)
    c_out_pad = _round_up(c_out, _LANE)
    w_p = jnp.zeros((c_in_pad, c_out_pad, k_total), cdt)
    w_p = w_p.at[:c_in, :c_out, :].set(weight.astype(cdt))
    return jnp.transpose(w_p, (2, 0, 1)).reshape(k_total * c_in_pad, c_out_pad)


@functools.partial(
    jax.jit,
    static_argnames=("conv_order_down", "conv_order_up", "update_func",
                     "compute_dtype", "c_out", "single_buffered"))
def _snn_forward_impl(x, laplacian_down, laplacian_up, weight_flat, *,
                      conv_order_down, conv_order_up, update_func,
                      compute_dtype, c_out, single_buffered):
    n, c_in = x.shape
    k_total = 1 + conv_order_down + conv_order_up
    cdt = _compute_dtype(compute_dtype)
    isz = jnp.dtype(cdt).itemsize

    kc_pad, c_out_pad = weight_flat.shape
    assert kc_pad % k_total == 0
    c_in_pad = kc_pad // k_total
    assert c_in_pad % _LANE == 0 and c_in_pad >= c_in
    assert c_out_pad % _LANE == 0 and c_out_pad >= c_out

    # Lane-dense x: zero-pad channels up to 128 lanes (tiny (N,128) array).
    x_p = jnp.zeros((n, c_in_pad), cdt).at[:, :c_in].set(x.astype(cdt))

    def _spec(shape):
        ndim = len(shape)
        if single_buffered:
            # grid=(1,): double-buffering buys nothing; halve resident VMEM.
            return pl.BlockSpec(shape, lambda *_: (0,) * ndim,
                                pipeline_mode=pl.Buffered(1))
        return pl.BlockSpec(shape, lambda *_: (0,) * ndim)

    sub = 8 if isz == 4 else 16          # sublane packing of the compute dtype
    n_sub = _round_up(n, sub)
    n_lane = _round_up(n, _LANE)         # L's last dim is the lane dim

    operands = [x_p]
    in_specs = [_spec((n, c_in_pad))]
    lap_hbm_bytes = 0
    lap_vmem_bytes = 0
    if conv_order_down > 0:
        operands.append(laplacian_down.astype(cdt))   # no (N,N) pad materialization
        in_specs.append(_spec((n, n)))
        lap_hbm_bytes += n * n * isz
        lap_vmem_bytes += n_sub * n_lane * isz
    if conv_order_up > 0:
        operands.append(laplacian_up.astype(cdt))
        in_specs.append(_spec((n, n)))
        lap_hbm_bytes += n * n * isz
        lap_vmem_bytes += n_sub * n_lane * isz
    operands.append(weight_flat.astype(cdt))
    in_specs.append(_spec((kc_pad, c_out_pad)))

    out_dtype = x.dtype
    out_isz = jnp.dtype(out_dtype).itemsize

    kernel = _make_snn_kernel(conv_order_down, conv_order_up, update_func,
                              cdt, c_in_pad)

    # ---- VMEM budget: buffering-aware, includes L's internal lane padding ----
    nbuf = 1 if single_buffered else 2
    x_vmem = n_sub * c_in_pad * isz
    w_vmem = _round_up(kc_pad, sub) * c_out_pad * isz
    out_vmem = _round_up(n, 8 if out_isz == 4 else 16) * c_out_pad * out_isz
    slab_vmem = n_sub * k_total * c_in_pad * isz
    est = nbuf * (x_vmem + lap_vmem_bytes + w_vmem + out_vmem) \
        + slab_vmem + (8 << 20)
    try:
        cap = int(pltpu.get_tpu_info().vmem_capacity_bytes)
    except Exception:
        cap = 64 << 20   # conservative: fits every current TPU generation
    vmem_limit = int(min(max(est, 16 << 20), cap - (4 << 20)))

    # Advisory cost estimate (128-wide MXU outputs -> ~50% of a 256-wide MXU).
    flops = (2 * n * n * c_in_pad * (conv_order_down + conv_order_up)
             + 2 * n * kc_pad * c_out_pad)
    bytes_accessed = (n * c_in_pad * isz + lap_hbm_bytes
                      + kc_pad * c_out_pad * isz + n * c_out_pad * out_isz)
    try:
        cost = pl.CostEstimate(
            flops=flops,
            transcendentals=n * c_out_pad if update_func == "sigmoid" else 0,
            bytes_accessed=bytes_accessed)
    except Exception:
        cost = None

    out_p = pl.pallas_call(
        kernel,
        out_shape=jax.ShapeDtypeStruct((n, c_out_pad), out_dtype),
        grid=(1,),
        in_specs=in_specs,
        out_specs=_spec((n, c_out_pad)),
        scratch_shapes=[pltpu.VMEM((n, k_total * c_in_pad), cdt)],
        compiler_params=pltpu.CompilerParams(
            dimension_semantics=("arbitrary",),
            vmem_limit_bytes=vmem_limit),
        cost_estimate=cost,
    )(*operands)

    return out_p[:, :c_out]


def snn_layer_forward(x, laplacian_down, laplacian_up, weight_flat, *,
                      conv_order_down, conv_order_up, c_out,
                      update_func=None, compute_dtype="bfloat16"):
    """Pallas implementation of SNNLayer.forward (aggr_norm=False).

    x:               (N, C_in)
    laplacian_down:  (N, N)   (ignored if conv_order_down == 0)
    laplacian_up:    (N, N)   (ignored if conv_order_up == 0)
    weight_flat:     output of prepare_snn_weight (one-time param transform)
    compute_dtype:   "bfloat16" (default fast path; f32 accumulation on the
                     MXU — error compounds mildly with conv order) or
                     "float32" (exact path)
    returns:         (N, c_out) in x.dtype
    """
    kwargs = dict(conv_order_down=conv_order_down, conv_order_up=conv_order_up,
                  update_func=update_func, compute_dtype=compute_dtype,
                  c_out=c_out)
    try:
        return _snn_forward_impl(x, laplacian_down, laplacian_up, weight_flat,
                                 single_buffered=True, **kwargs)
    except Exception:
        # Fallback for jax versions without BlockSpec(pipeline_mode=Buffered).
        return _snn_forward_impl(x, laplacian_down, laplacian_up, weight_flat,
                                 single_buffered=False, **kwargs)


def snn_layer_reference(x, laplacian_down, laplacian_up, weight,
                        conv_order_down, conv_order_up, update_func=None):
    """Pure-JAX mirror of the PyTorch forward (aggr_norm=False) for checking."""
    def cheb(conv_op, order, x_):
        outs = []
        cur = x_
        for _ in range(order):
            cur = conv_op @ cur
            outs.append(cur)
        return jnp.stack(outs, axis=2)  # (N, C, order)

    parts = [x[:, :, None]]
    if conv_order_down > 0:
        parts.append(cheb(laplacian_down, conv_order_down, x))
    if conv_order_up > 0:
        parts.append(cheb(laplacian_up, conv_order_up, x))
    x_cat = jnp.concatenate(parts, axis=2)  # (N, C_in, K)
    y = jnp.einsum("nik,iok->no", x_cat, weight)
    if update_func == "sigmoid":
        return jax.nn.sigmoid(y)
    if update_func == "relu":
        return jnp.maximum(y, 0.0)
    return y


def xavier_uniform(key, shape, gain=1.414):
    """torch.nn.init.xavier_uniform_ for a (in, out, *rest) tensor."""
    receptive = 1
    for d in shape[2:]:
        receptive *= d
    fan_in = shape[1] * receptive
    fan_out = shape[0] * receptive
    bound = gain * (6.0 / (fan_in + fan_out)) ** 0.5
    return jax.random.uniform(key, shape, jnp.float32, -bound, bound)


if __name__ == "__main__":
    # Small, module-consistent shapes.
    N = 64           # num_simplices
    C_IN = 16        # in_channels
    C_OUT = 32       # out_channels
    KD, KU = 2, 2    # conv_order_down, conv_order_up
    UPDATE = "sigmoid"

    key = jax.random.PRNGKey(0)
    kx, kd_key, ku_key, kw = jax.random.split(key, 4)

    x = jax.random.normal(kx, (N, C_IN), jnp.float32)

    # Symmetric dense "Laplacian" operators (sparse ops treated as dense).
    a_down = jax.random.normal(kd_key, (N, N), jnp.float32) * 0.1
    lap_down = a_down + a_down.T
    a_up = jax.random.normal(ku_key, (N, N), jnp.float32) * 0.1
    lap_up = a_up + a_up.T

    # Deterministic xavier_uniform init of weight (in, out, 1 + Kd + Ku).
    weight = xavier_uniform(kw, (C_IN, C_OUT, 1 + KD + KU), gain=1.414)

    ref = snn_layer_reference(x, lap_down, lap_up, weight, KD, KU, UPDATE)

    # One-time parameter transform (hoisted out of the forward path).
    w_bf16 = prepare_snn_weight(weight, conv_order_down=KD, conv_order_up=KU,
                                compute_dtype="bfloat16")
    w_f32 = prepare_snn_weight(weight, conv_order_down=KD, conv_order_up=KU,
                               compute_dtype="float32")

    # Default fast path: bf16 operands, f32 accumulation on the MXU.
    out_bf16 = snn_layer_forward(x, lap_down, lap_up, w_bf16,
                                 conv_order_down=KD, conv_order_up=KU,
                                 c_out=C_OUT, update_func=UPDATE)
    out_bf16 = jax.block_until_ready(out_bf16)
    assert out_bf16.shape == (N, C_OUT)
    assert jnp.allclose(out_bf16, ref, atol=5e-2, rtol=5e-2), \
        "bf16 mismatch vs ref"

    # Exact float32 path.
    out_f32 = snn_layer_forward(x, lap_down, lap_up, w_f32,
                                conv_order_down=KD, conv_order_up=KU,
                                c_out=C_OUT, update_func=UPDATE,
                                compute_dtype="float32")
    out_f32 = jax.block_until_ready(out_f32)
    assert out_f32.shape == (N, C_OUT)
    assert jnp.allclose(out_f32, ref, atol=3e-5, rtol=3e-5), \
        "f32 mismatch vs ref"

    print("KERNEL_OK")
</pallas_src>

<mosaic_0001>
module attributes {stable_mosaic.version = 11 : i64} {
  func.func @kernel(%arg0: i32, %arg1: memref<64x128xbf16, #tpu.memory_space<vmem>>, %arg2: memref<64x64xbf16, #tpu.memory_space<vmem>>, %arg3: memref<64x64xbf16, #tpu.memory_space<vmem>>, %arg4: memref<640x128xbf16, #tpu.memory_space<vmem>>, %arg5: memref<64x128xf32, #tpu.memory_space<vmem>>, %arg6: memref<64x640xbf16, #tpu.memory_space<vmem>>) attributes {dimension_semantics = [#tpu.dimension_semantics<arbitrary>], iteration_bounds = array<i64: 1>, scalar_prefetch = 0 : i64, scratch_operands = 1 : i64, tpu.core_type = #tpu.core_type<tc>, window_params = [{pipeline_mode = #tpu.pipeline_mode<synchronous>, transform_indices = @transform_0, window_bounds = array<i64: 64, 128>}, {pipeline_mode = #tpu.pipeline_mode<synchronous>, transform_indices = @transform_1, window_bounds = array<i64: 64, 64>}, {pipeline_mode = #tpu.pipeline_mode<synchronous>, transform_indices = @transform_2, window_bounds = array<i64: 64, 64>}, {pipeline_mode = #tpu.pipeline_mode<synchronous>, transform_indices = @transform_3, window_bounds = array<i64: 640, 128>}, {pipeline_mode = #tpu.pipeline_mode<synchronous>, transform_indices = @transform_4, window_bounds = array<i64: 64, 128>}]} {
    %c0 = arith.constant 0 : index
    %c0_0 = arith.constant 0 : index
    %0 = vector.load %arg1[%c0, %c0_0] : memref<64x128xbf16, #tpu.memory_space<vmem>>, vector<64x128xbf16>
    %c0_1 = arith.constant 0 : index
    %c0_2 = arith.constant 0 : index
    %1 = vector.load %arg6[%c0_1, %c0_2] : memref<64x640xbf16, #tpu.memory_space<vmem>>, vector<64x128xbf16>
    tpu.vector_store %arg6[%c0_1, %c0_2], %0 {strides = array<i32>} : memref<64x640xbf16, #tpu.memory_space<vmem>>, vector<64x128xbf16>,
    %c0_3 = arith.constant 0 : index
    %c0_4 = arith.constant 0 : index
    %2 = vector.load %arg2[%c0_3, %c0_4] : memref<64x64xbf16, #tpu.memory_space<vmem>>, vector<64x64xbf16>
    %c0_5 = arith.constant 0 : index
    %c0_6 = arith.constant 0 : index
    %3 = vector.load %arg3[%c0_5, %c0_6] : memref<64x64xbf16, #tpu.memory_space<vmem>>, vector<64x64xbf16>
    %cst = arith.constant dense<0.000000e+00> : vector<64x128xf32>
    %4 = tpu.matmul %2, %0, %cst {dimension_numbers = #tpu.dot_dimension_numbers<[1], [0], [0], [1], [0, 0, 1, 1], [], []>} : vector<64x64xbf16>, vector<64x128xbf16>, vector<64x128xf32> -> vector<64x128xf32>
    %5 = arith.truncf %4 : vector<64x128xf32> to vector<64x128xbf16>
    %c0_7 = arith.constant 0 : index
    %c128 = arith.constant 128 : index
    %6 = vector.load %arg6[%c0_7, %c128] : memref<64x640xbf16, #tpu.memory_space<vmem>>, vector<64x128xbf16>
    tpu.vector_store %arg6[%c0_7, %c128], %5 {strides = array<i32>} : memref<64x640xbf16, #tpu.memory_space<vmem>>, vector<64x128xbf16>,
    %cst_8 = arith.constant dense<0.000000e+00> : vector<64x128xf32>
    %7 = tpu.matmul %3, %0, %cst_8 {dimension_numbers = #tpu.dot_dimension_numbers<[1], [0], [0], [1], [0, 0, 1, 1], [], []>} : vector<64x64xbf16>, vector<64x128xbf16>, vector<64x128xf32> -> vector<64x128xf32>
    %8 = arith.truncf %7 : vector<64x128xf32> to vector<64x128xbf16>
    %c0_9 = arith.constant 0 : index
    %c384 = arith.constant 384 : index
    %9 = vector.load %arg6[%c0_9, %c384] : memref<64x640xbf16, #tpu.memory_space<vmem>>, vector<64x128xbf16>
    tpu.vector_store %arg6[%c0_9, %c384], %8 {strides = array<i32>} : memref<64x640xbf16, #tpu.memory_space<vmem>>, vector<64x128xbf16>,
    %cst_10 = arith.constant dense<0.000000e+00> : vector<64x128xf32>
    %10 = tpu.matmul %2, %5, %cst_10 {dimension_numbers = #tpu.dot_dimension_numbers<[1], [0], [0], [1], [0, 0, 1, 1], [], []>} : vector<64x64xbf16>, vector<64x128xbf16>, vector<64x128xf32> -> vector<64x128xf32>
    %11 = arith.truncf %10 : vector<64x128xf32> to vector<64x128xbf16>
    %c0_11 = arith.constant 0 : index
    %c256 = arith.constant 256 : index
    %12 = vector.load %arg6[%c0_11, %c256] : memref<64x640xbf16, #tpu.memory_space<vmem>>, vector<64x128xbf16>
    tpu.vector_store %arg6[%c0_11, %c256], %11 {strides = array<i32>} : memref<64x640xbf16, #tpu.memory_space<vmem>>, vector<64x128xbf16>,
    %cst_12 = arith.constant dense<0.000000e+00> : vector<64x128xf32>
    %13 = tpu.matmul %3, %8, %cst_12 {dimension_numbers = #tpu.dot_dimension_numbers<[1], [0], [0], [1], [0, 0, 1, 1], [], []>} : vector<64x64xbf16>, vector<64x128xbf16>, vector<64x128xf32> -> vector<64x128xf32>
    %14 = arith.truncf %13 : vector<64x128xf32> to vector<64x128xbf16>
    %c0_13 = arith.constant 0 : index
    %c512 = arith.constant 512 : index
    %15 = vector.load %arg6[%c0_13, %c512] : memref<64x640xbf16, #tpu.memory_space<vmem>>, vector<64x128xbf16>
    tpu.vector_store %arg6[%c0_13, %c512], %14 {strides = array<i32>} : memref<64x640xbf16, #tpu.memory_space<vmem>>, vector<64x128xbf16>,
    %c0_14 = arith.constant 0 : index
    %c0_15 = arith.constant 0 : index
    %16 = vector.load %arg6[%c0_14, %c0_15] : memref<64x640xbf16, #tpu.memory_space<vmem>>, vector<64x640xbf16>
    %c0_16 = arith.constant 0 : index
    %c0_17 = arith.constant 0 : index
    %17 = vector.load %arg4[%c0_16, %c0_17] : memref<640x128xbf16, #tpu.memory_space<vmem>>, vector<640x128xbf16>
    %cst_18 = arith.constant dense<0.000000e+00> : vector<64x128xf32>
    %18 = tpu.matmul %16, %17, %cst_18 {dimension_numbers = #tpu.dot_dimension_numbers<[1], [0], [0], [1], [0, 0, 1, 1], [], []>} : vector<64x640xbf16>, vector<640x128xbf16>, vector<64x128xf32> -> vector<64x128xf32>
    %19 = arith.negf %18 : vector<64x128xf32>
    %20 = math.exp %19 : vector<64x128xf32>
    %cst_19 = arith.constant 1.000000e+00 : f32
    %21 = vector.broadcast %cst_19 : f32 to vector<64x128xf32>
    %22 = arith.addf %21, %20 : vector<64x128xf32>
    %23 = arith.divf %21, %22 : vector<64x128xf32>
    %c0_20 = arith.constant 0 : index
    %c0_21 = arith.constant 0 : index
    %24 = vector.load %arg5[%c0_20, %c0_21] : memref<64x128xf32, #tpu.memory_space<vmem>>, vector<64x128xf32>
    tpu.vector_store %arg5[%c0_20, %c0_21], %23 {strides = array<i32>} : memref<64x128xf32, #tpu.memory_space<vmem>>, vector<64x128xf32>,
    return
  }
  func.func @transform_0(%arg0: i32) -> (i32, i32) {
    %c0_i32 = arith.constant 0 : i32
    %c0_i32_0 = arith.constant 0 : i32
    %c0_i32_1 = arith.constant 0 : i32
    return %c0_i32, %c0_i32_0 : i32, i32
  }
  func.func @transform_1(%arg0: i32) -> (i32, i32) {
    %c0_i32 = arith.constant 0 : i32
    %c0_i32_0 = arith.constant 0 : i32
    %c0_i32_1 = arith.constant 0 : i32
    return %c0_i32, %c0_i32_0 : i32, i32
  }
  func.func @transform_2(%arg0: i32) -> (i32, i32) {
    %c0_i32 = arith.constant 0 : i32
    %c0_i32_0 = arith.constant 0 : i32
    %c0_i32_1 = arith.constant 0 : i32
    return %c0_i32, %c0_i32_0 : i32, i32
  }
  func.func @transform_3(%arg0: i32) -> (i32, i32) {
    %c0_i32 = arith.constant 0 : i32
    %c0_i32_0 = arith.constant 0 : i32
    %c0_i32_1 = arith.constant 0 : i32
    return %c0_i32, %c0_i32_0 : i32, i32
  }
  func.func @transform_4(%arg0: i32) -> (i32, i32) {
    %c0_i32 = arith.constant 0 : i32
    %c0_i32_0 = arith.constant 0 : i32
    %c0_i32_1 = arith.constant 0 : i32
    return %c0_i32, %c0_i32_0 : i32, i32
  }
}

module attributes {stable_mosaic.version = 11 : i64} {
  func.func @kernel(%arg0: i32, %arg1: memref<64x128xbf16, #tpu.memory_space<vmem>>, %arg2: memref<64x64xbf16, #tpu.memory_space<vmem>>, %arg3: memref<64x64xbf16, #tpu.memory_space<vmem>>, %arg4: memref<640x128xbf16, #tpu.memory_space<vmem>>, %arg5: memref<64x128xf32, #tpu.memory_space<vmem>>, %arg6: memref<64x640xbf16, #tpu.memory_space<vmem>>) attributes {dimension_semantics = [#tpu.dimension_semantics<arbitrary>], iteration_bounds = array<i64: 1>, scalar_prefetch = 0 : i64, scratch_operands = 1 : i64, tpu.core_type = #tpu.core_type<tc>, window_params = [{pipeline_mode = #tpu.pipeline_mode<synchronous>, transform_indices = @transform_0, window_bounds = array<i64: 64, 128>}, {pipeline_mode = #tpu.pipeline_mode<synchronous>, transform_indices = @transform_1, window_bounds = array<i64: 64, 64>}, {pipeline_mode = #tpu.pipeline_mode<synchronous>, transform_indices = @transform_2, window_bounds = array<i64: 64, 64>}, {pipeline_mode = #tpu.pipeline_mode<synchronous>, transform_indices = @transform_3, window_bounds = array<i64: 640, 128>}, {pipeline_mode = #tpu.pipeline_mode<synchronous>, transform_indices = @transform_4, window_bounds = array<i64: 64, 128>}]} {
    %c0 = arith.constant 0 : index
    %c0_0 = arith.constant 0 : index
    %0 = vector.load %arg1[%c0, %c0_0] : memref<64x128xbf16, #tpu.memory_space<vmem>>, vector<64x128xbf16>
    %c0_1 = arith.constant 0 : index
    %c0_2 = arith.constant 0 : index
    %1 = vector.load %arg6[%c0_1, %c0_2] : memref<64x640xbf16, #tpu.memory_space<vmem>>, vector<64x128xbf16>
    tpu.vector_store %arg6[%c0_1, %c0_2], %0 {strides = array<i32>} : memref<64x640xbf16, #tpu.memory_space<vmem>>, vector<64x128xbf16>,
    %c0_3 = arith.constant 0 : index
    %c0_4 = arith.constant 0 : index
    %2 = vector.load %arg2[%c0_3, %c0_4] : memref<64x64xbf16, #tpu.memory_space<vmem>>, vector<64x64xbf16>
    %c0_5 = arith.constant 0 : index
    %c0_6 = arith.constant 0 : index
    %3 = vector.load %arg3[%c0_5, %c0_6] : memref<64x64xbf16, #tpu.memory_space<vmem>>, vector<64x64xbf16>
    %cst = arith.constant dense<0.000000e+00> : vector<64x128xf32>
    %4 = tpu.matmul %2, %0, %cst {dimension_numbers = #tpu.dot_dimension_numbers<[1], [0], [0], [1], [0, 0, 1, 1], [], []>} : vector<64x64xbf16>, vector<64x128xbf16>, vector<64x128xf32> -> vector<64x128xf32>
    %5 = arith.truncf %4 : vector<64x128xf32> to vector<64x128xbf16>
    %c0_7 = arith.constant 0 : index
    %c128 = arith.constant 128 : index
    %6 = vector.load %arg6[%c0_7, %c128] : memref<64x640xbf16, #tpu.memory_space<vmem>>, vector<64x128xbf16>
    tpu.vector_store %arg6[%c0_7, %c128], %5 {strides = array<i32>} : memref<64x640xbf16, #tpu.memory_space<vmem>>, vector<64x128xbf16>,
    %cst_8 = arith.constant dense<0.000000e+00> : vector<64x128xf32>
    %7 = tpu.matmul %3, %0, %cst_8 {dimension_numbers = #tpu.dot_dimension_numbers<[1], [0], [0], [1], [0, 0, 1, 1], [], []>} : vector<64x64xbf16>, vector<64x128xbf16>, vector<64x128xf32> -> vector<64x128xf32>
    %8 = arith.truncf %7 : vector<64x128xf32> to vector<64x128xbf16>
    %c0_9 = arith.constant 0 : index
    %c384 = arith.constant 384 : index
    %9 = vector.load %arg6[%c0_9, %c384] : memref<64x640xbf16, #tpu.memory_space<vmem>>, vector<64x128xbf16>
    tpu.vector_store %arg6[%c0_9, %c384], %8 {strides = array<i32>} : memref<64x640xbf16, #tpu.memory_space<vmem>>, vector<64x128xbf16>,
    %cst_10 = arith.constant dense<0.000000e+00> : vector<64x128xf32>
    %10 = tpu.matmul %2, %5, %cst_10 {dimension_numbers = #tpu.dot_dimension_numbers<[1], [0], [0], [1], [0, 0, 1, 1], [], []>} : vector<64x64xbf16>, vector<64x128xbf16>, vector<64x128xf32> -> vector<64x128xf32>
    %11 = arith.truncf %10 : vector<64x128xf32> to vector<64x128xbf16>
    %c0_11 = arith.constant 0 : index
    %c256 = arith.constant 256 : index
    %12 = vector.load %arg6[%c0_11, %c256] : memref<64x640xbf16, #tpu.memory_space<vmem>>, vector<64x128xbf16>
    tpu.vector_store %arg6[%c0_11, %c256], %11 {strides = array<i32>} : memref<64x640xbf16, #tpu.memory_space<vmem>>, vector<64x128xbf16>,
    %cst_12 = arith.constant dense<0.000000e+00> : vector<64x128xf32>
    %13 = tpu.matmul %3, %8, %cst_12 {dimension_numbers = #tpu.dot_dimension_numbers<[1], [0], [0], [1], [0, 0, 1, 1], [], []>} : vector<64x64xbf16>, vector<64x128xbf16>, vector<64x128xf32> -> vector<64x128xf32>
    %14 = arith.truncf %13 : vector<64x128xf32> to vector<64x128xbf16>
    %c0_13 = arith.constant 0 : index
    %c512 = arith.constant 512 : index
    %15 = vector.load %arg6[%c0_13, %c512] : memref<64x640xbf16, #tpu.memory_space<vmem>>, vector<64x128xbf16>
    tpu.vector_store %arg6[%c0_13, %c512], %14 {strides = array<i32>} : memref<64x640xbf16, #tpu.memory_space<vmem>>, vector<64x128xbf16>,
    %c0_14 = arith.constant 0 : index
    %c0_15 = arith.constant 0 : index
    %16 = vector.load %arg6[%c0_14, %c0_15] : memref<64x640xbf16, #tpu.memory_space<vmem>>, vector<64x640xbf16>
    %c0_16 = arith.constant 0 : index
    %c0_17 = arith.constant 0 : index
    %17 = vector.load %arg4[%c0_16, %c0_17] : memref<640x128xbf16, #tpu.memory_space<vmem>>, vector<640x128xbf16>
    %cst_18 = arith.constant dense<0.000000e+00> : vector<64x128xf32>
    %18 = tpu.matmul %16, %17, %cst_18 {dimension_numbers = #tpu.dot_dimension_numbers<[1], [0], [0], [1], [0, 0, 1, 1], [], []>} : vector<64x640xbf16>, vector<640x128xbf16>, vector<64x128xf32> -> vector<64x128xf32>
    %19 = arith.negf %18 : vector<64x128xf32>
    %20 = math.exp %19 : vector<64x128xf32>
    %cst_19 = arith.constant 1.000000e+00 : f32
    %21 = vector.broadcast %cst_19 : f32 to vector<64x128xf32>
    %22 = arith.addf %21, %20 : vector<64x128xf32>
    %23 = arith.divf %21, %22 : vector<64x128xf32>
    %c0_20 = arith.constant 0 : index
    %c0_21 = arith.constant 0 : index
    %24 = vector.load %arg5[%c0_20, %c0_21] : memref<64x128xf32, #tpu.memory_space<vmem>>, vector<64x128xf32>
    tpu.vector_store %arg5[%c0_20, %c0_21], %23 {strides = array<i32>} : memref<64x128xf32, #tpu.memory_space<vmem>>, vector<64x128xf32>,
    return
  }
  func.func @transform_0(%arg0: i32) -> (i32, i32) {
    %c0_i32 = arith.constant 0 : i32
    %c0_i32_0 = arith.constant 0 : i32
    %c0_i32_1 = arith.constant 0 : i32
    return %c0_i32, %c0_i32_0 : i32, i32
  }
  func.func @transform_1(%arg0: i32) -> (i32, i32) {
    %c0_i32 = arith.constant 0 : i32
    %c0_i32_0 = arith.constant 0 : i32
    %c0_i32_1 = arith.constant 0 : i32
    return %c0_i32, %c0_i32_0 : i32, i32
  }
  func.func @transform_2(%arg0: i32) -> (i32, i32) {
    %c0_i32 = arith.constant 0 : i32
    %c0_i32_0 = arith.constant 0 : i32
    %c0_i32_1 = arith.constant 0 : i32
    return %c0_i32, %c0_i32_0 : i32, i32
  }
  func.func @transform_3(%arg0: i32) -> (i32, i32) {
    %c0_i32 = arith.constant 0 : i32
    %c0_i32_0 = arith.constant 0 : i32
    %c0_i32_1 = arith.constant 0 : i32
    return %c0_i32, %c0_i32_0 : i32, i32
  }
  func.func @transform_4(%arg0: i32) -> (i32, i32) {
    %c0_i32 = arith.constant 0 : i32
    %c0_i32_0 = arith.constant 0 : i32
    %c0_i32_1 = arith.constant 0 : i32
    return %c0_i32, %c0_i32_0 : i32, i32
  }
}

</mosaic_0001>

<bundles_post_ra>
// kernel: _snn_forward_impl.1
= control target key start
LH: loop header
LB: loop body
LE: loop exit
PB: predicated region body
PF: predicated region fallthrough
CT: control target
= control target key end

     0   :  { %vm90_vm0 = vcmask 523264   ;;  %s1713_s0 = inlined_call_operand.vmem [shape: bf16[64,128], index: 0, kind: input, shape index: {}]   ;;  %s1714_s1 = inlined_call_operand.vmem [shape: bf16[64,64], index: 1, kind: input, shape index: {}]   ;;  %s1715_s2 = inlined_call_operand.vmem [shape: bf16[64,64], index: 2, kind: input, shape index: {}]   ;;  %s1716_s3 = inlined_call_operand.vmem [shape: bf16[640,128], index: 3, kind: input, shape index: {}]   ;;  %s1717_s4 = inlined_call_operand.vmem [shape: f32[64,128], index: 4, kind: output, shape index: {}]  }
   0x1   :  { %v1438_v0 = vld [vmem:[%s1713_s0] sm:$0xff]   ;;  %v1443_v1 = vld [vmem:[%s1713_s0 + $0x8] sm:$0xff]   ;;  %v1452_v2 = vld [vmem:[%s1713_s0 + $0x10] sm:$0xff]  }
   0x2   :  { %1222 = vmatprep.subr.bf16.mxu0 %v1438_v0  ;;  %1238 = vmatprep.subr.bf16.mxu1 %v1438_v0  ;;  %v1330_v3 = vld [vmem:[%s1714_s1] sm:$0xff]   ;;  %v1470_v5 = vld [vmem:[%s1713_s0 + $0x18] sm:$0xff]   ;;  %v1480_v6 = vld [vmem:[%s1714_s1 + $0x8] sm:$0xff]  }
   0x3   :  { %1223 = vmatpush3.bf16.msra.mxu0 %v1438_v0  ;;  %1239 = vmatpush3.bf16.msra.mxu1 %v1438_v0  ;;  %v1331_v4 = vld [vmem:[%s1715_s2] sm:$0xff]   ;;  %v1485_v7 = vld [vmem:[%s1715_s2 + $0x8] sm:$0xff]   ;;  %v1492_v8 = vld [vmem:[%s1714_s1 + $0x10] sm:$0xff]  }
   0x4   :  { %1224 = vmatprep.subr.bf16.mxu0 %v1443_v1  ;;  %1240 = vmatprep.subr.bf16.mxu1 %v1443_v1  ;;  %v1497_v9 = vld [vmem:[%s1715_s2 + $0x10] sm:$0xff]   ;;  %v1510_v10 = vld [vmem:[%s1714_s1 + $0x18] sm:$0xff]   ;;  %v1338_v36 = vld [vmem:[%s1716_s3 + $0x40] sm:$0xff]  }
   0x5   :  { %1230 = vmatprep.mubr.msk.bf16.mxu0 %vm90_vm0, %v1330_v3  ;;  %1246 = vmatprep.mubr.msk.bf16.mxu1 %vm90_vm0, %v1331_v4  ;;  %v1515_v11 = vld [vmem:[%s1715_s2 + $0x18] sm:$0xff]   ;;  %v1354_v37 = vld [vmem:[%s1716_s3 + $0xc0] sm:$0xff]   ;;  %v1340_v39 = vld [vmem:[%s1716_s3 + $0x48] sm:$0xff]  }
   0x6   :  { %v1339_v38 = vld [vmem:[%s1716_s3] sm:$0xff]   ;;  %v1356_v41 = vld [vmem:[%s1716_s3 + $0xc8] sm:$0xff]   ;;  %v1342_v43 = vld [vmem:[%s1716_s3 + $0x50] sm:$0xff]  }
   0x7   :  { %1225 = vmatpush3.bf16.msra.mxu0 %v1443_v1  ;;  %1241 = vmatpush3.bf16.msra.mxu1 %v1443_v1  ;;  %v1355_v40 = vld [vmem:[%s1716_s3 + $0x80] sm:$0xff]   ;;  %v1341_v42 = vld [vmem:[%s1716_s3 + $0x8] sm:$0xff]   ;;  %v1343_v45 = vld [vmem:[%s1716_s3 + $0x10] sm:$0xff]  }
   0x8   :  { %1226 = vmatprep.subr.bf16.mxu0 %v1452_v2  ;;  %1242 = vmatprep.subr.bf16.mxu1 %v1452_v2  ;;  %v1358_v44 = vld [vmem:[%s1716_s3 + $0x88] sm:$0xff]   ;;  %v1344_v46 = vld [vmem:[%s1716_s3 + $0x58] sm:$0xff]   ;;  %v1359_v47 = vld [vmem:[%s1716_s3 + $0xd0] sm:$0xff]  }
   0x9   :  { %v1361_v48 = vld [vmem:[%s1716_s3 + $0x90] sm:$0xff]   ;;  %v1345_v49 = vld [vmem:[%s1716_s3 + $0x18] sm:$0xff]   ;;  %v1346_v51 = vld [vmem:[%s1716_s3 + $0x60] sm:$0xff]  }
   0xa   :  { %v1362_v50 = vld [vmem:[%s1716_s3 + $0xd8] sm:$0xff]   ;;  %v1347_v53 = vld [vmem:[%s1716_s3 + $0x20] sm:$0xff]   ;;  %v1348_v55 = vld [vmem:[%s1716_s3 + $0x68] sm:$0xff]  }
   0xb   :  { %1227 = vmatpush3.bf16.msra.mxu0 %v1452_v2  ;;  %1243 = vmatpush3.bf16.msra.mxu1 %v1452_v2  ;;  %v1364_v52 = vld [vmem:[%s1716_s3 + $0x98] sm:$0xff]   ;;  %v1365_v54 = vld [vmem:[%s1716_s3 + $0xe0] sm:$0xff]   ;;  %v1349_v57 = vld [vmem:[%s1716_s3 + $0x28] sm:$0xff]  }
   0xc   :  { %1228 = vmatprep.subr.bf16.mxu0 %v1470_v5  ;;  %1244 = vmatprep.subr.bf16.mxu1 %v1470_v5  ;;  %v1367_v56 = vld [vmem:[%s1716_s3 + $0xa0] sm:$0xff]   ;;  %v1368_v58 = vld [vmem:[%s1716_s3 + $0xe8] sm:$0xff]   ;;  %v1350_v59 = vld [vmem:[%s1716_s3 + $0x70] sm:$0xff]  }
   0xd   :  { %v1370_v60 = vld [vmem:[%s1716_s3 + $0xa8] sm:$0xff]   ;;  %v1351_v61 = vld [vmem:[%s1716_s3 + $0x30] sm:$0xff]   ;;  %v1352_v63 = vld [vmem:[%s1716_s3 + $0x78] sm:$0xff]  }
   0xe   :  { %v1371_v62 = vld [vmem:[%s1716_s3 + $0xf0] sm:$0xff]  }
   0xf   :  { %1229 = vmatpush3.bf16.msra.mxu0 %v1470_v5  ;;  %1245 = vmatpush3.bf16.msra.mxu1 %v1470_v5 }
  0x12   :  { %1231 = vmatmul.mubr.msk.bf16.vlgmr.msra.gmra.mrb[0].mxu0 %vm90_vm0, %v1480_v6  ;;  %1247 = vmatmul.mubr.msk.bf16.vlgmr.msra.gmra.mrb[0].mxu1 %vm90_vm0, %v1485_v7 }
  0x13   :  { %1234 = vmatprep.mubr.msk.bf16.mxu0 %vm90_vm0, %v1492_v8  ;;  %1250 = vmatprep.mubr.msk.bf16.mxu1 %vm90_vm0, %v1497_v9 }
  0x1a   :  { %1235 = vmatmul.mubr.msk.bf16.gmra.mrb[4].mxu0 %vm90_vm0, %v1510_v10  ;;  %1251 = vmatmul.mubr.msk.bf16.gmra.mrb[4].mxu1 %vm90_vm0, %v1515_v11 }
  0x1b   :  { %1262 = vmatprep.mubr.msk.bf16.mxu0 %vm90_vm0, %v1330_v3  ;;  %1278 = vmatprep.mubr.msk.bf16.mxu1 %vm90_vm0, %v1331_v4  ;;  %v1373_v3 = vld [vmem:[%s1716_s3 + $0xb0] sm:$0xff]   ;;  %v1353_v4 = vld [vmem:[%s1716_s3 + $0x38] sm:$0xff]  }
  0xe5   :  { %v1232_v12 = vpop.f32.mrb[0].mxu0  ;;  %v1248_v13 = vpop.f32.mrb[0].mxu1 }
  0xe6   :  { %v137_v14 = vpop.f32.mrb[1].mxu0  ;;  %v242_v15 = vpop.f32.mrb[1].mxu1 }
  0xe7   :  { %v1233_v16 = vpop.f32.mrb[2].mxu0  ;;  %v1249_v17 = vpop.f32.mrb[2].mxu1 }
  0xe8   :  { %v1523_v18 = vpack.c.bf16 %v1233_v16, %v1232_v12  ;;  %v1525_v19 = vpack.c.bf16 %v1249_v17, %v1248_v13  ;;  %v140_v20 = vpop.f32.mrb[3].mxu0  ;;  %v245_v21 = vpop.f32.mrb[3].mxu1  ;;  %v1376_v12 = vld [vmem:[%s1716_s3 + $0xb8] sm:$0xff]  }
  0xe9   :  { %v168_v22 = vpack.c.bf16 %v140_v20, %v137_v14  ;;  %v273_v23 = vpack.c.bf16 %v245_v21, %v242_v15 }
  0xeb   :  { %1254 = vmatprep.subr.bf16.mxu0 %v168_v22  ;;  %1270 = vmatprep.subr.bf16.mxu1 %v273_v23 }
  0xec   :  { %1255 = vmatpush3.bf16.msra.mxu0 %v168_v22  ;;  %1271 = vmatpush3.bf16.msra.mxu1 %v273_v23 }
  0xed   :  { %v1236_v24 = vpop.f32.mrb[4].mxu0  ;;  %v1252_v25 = vpop.f32.mrb[4].mxu1  ;;  %1256 = vmatprep.subr.bf16.mxu0 %v1523_v18  ;;  %1272 = vmatprep.subr.bf16.mxu1 %v1525_v19 }
  0xee   :  { %v153_v26 = vpop.f32.mrb[5].mxu0  ;;  %v258_v27 = vpop.f32.mrb[5].mxu1 }
  0xef   :  { %v1237_v28 = vpop.f32.mrb[6].mxu0  ;;  %v1253_v29 = vpop.f32.mrb[6].mxu1 }
  0xf0   :  { %v1529_v30 = vpack.c.bf16 %v1237_v28, %v1236_v24  ;;  %v1531_v31 = vpack.c.bf16 %v1253_v29, %v1252_v25  ;;  %v156_v32 = vpop.f32.mrb[7].mxu0  ;;  %v261_v33 = vpop.f32.mrb[7].mxu1  ;;  %1257 = vmatpush3.bf16.msra.mxu0 %v1523_v18  ;;  %1273 = vmatpush3.bf16.msra.mxu1 %v1525_v19 }
  0xf1   :  { %v1535_v34 = vpack.c.bf16 %v156_v32, %v153_v26  ;;  %v1537_v35 = vpack.c.bf16 %v261_v33, %v258_v27 }
  0xf3   :  { %1258 = vmatprep.subr.bf16.mxu0 %v1535_v34  ;;  %1274 = vmatprep.subr.bf16.mxu1 %v1537_v35 }
  0xf4   :  { %1259 = vmatpush3.bf16.msra.mxu0 %v1535_v34  ;;  %1275 = vmatpush3.bf16.msra.mxu1 %v1537_v35 }
  0xf5   :  { %1260 = vmatprep.subr.bf16.mxu0 %v1529_v30  ;;  %1276 = vmatprep.subr.bf16.mxu1 %v1531_v31 }
  0xf8   :  { %1261 = vmatpush3.bf16.msra.mxu0 %v1529_v30  ;;  %1277 = vmatpush3.bf16.msra.mxu1 %v1531_v31 }
  0xf9   :  { %1130 = vmatprep.subr.bf16.mxu0 %v1338_v36  ;;  %1170 = vmatprep.subr.bf16.mxu1 %v1354_v37 }
  0xfb   :  { %1263 = vmatmul.mubr.msk.bf16.vlgmr.msra.gmra.mrb[8].mxu0 %vm90_vm0, %v1480_v6  ;;  %1279 = vmatmul.mubr.msk.bf16.vlgmr.msra.gmra.mrb[8].mxu1 %vm90_vm0, %v1485_v7  ;;  %v1357_v6 = vld [vmem:[%s1716_s3 + $0x100] sm:$0xff]   ;;  %v1360_v7 = vld [vmem:[%s1716_s3 + $0x108] sm:$0xff]  }
  0xfc   :  { %1131 = vmatpush3.bf16.msra.mxu0 %v1339_v38  ;;  %1266 = vmatprep.mubr.msk.bf16.mxu0 %vm90_vm0, %v1492_v8  ;;  %v1363_v8 = vld [vmem:[%s1716_s3 + $0x110] sm:$0xff]  }
  0xfd   :  { %1132 = vmatprep.subr.bf16.mxu0 %v1340_v39  ;;  %1282 = vmatprep.mubr.msk.bf16.mxu1 %vm90_vm0, %v1497_v9  ;;  %v1366_v9 = vld [vmem:[%s1716_s3 + $0x118] sm:$0xff]  }
  0xfe   :  { %1171 = vmatpush3.bf16.msra.mxu1 %v1355_v40 }
  0xff   :  { %1172 = vmatprep.subr.bf16.mxu1 %v1356_v41 }
 0x100   :  { %1133 = vmatpush3.bf16.msra.mxu0 %v1341_v42 }
 0x101   :  { %1134 = vmatprep.subr.bf16.mxu0 %v1342_v43 }
 0x102   :  { %1173 = vmatpush3.bf16.msra.mxu1 %v1358_v44 }
 0x103   :  { %1267 = vmatmul.mubr.msk.bf16.gmra.mrb[12].mxu0 %vm90_vm0, %v1510_v10  ;;  %1283 = vmatmul.mubr.msk.bf16.gmra.mrb[12].mxu1 %vm90_vm0, %v1515_v11  ;;  %v1372_v10 = vld [vmem:[%s1716_s3 + $0x128] sm:$0xff]   ;;  %v1375_v11 = vld [vmem:[%s1716_s3 + $0x130] sm:$0xff]  }
 0x104   :  { %1135 = vmatpush3.bf16.msra.mxu0 %v1343_v45  ;;  %799 = vmatprep.mubr.bf16.mxu0 %v168_v22 }
 0x105   :  { %864 = vmatprep.mubr.bf16.mxu1 %v273_v23  ;;  %1136 = vmatprep.subr.bf16.mxu0 %v1344_v46 }
 0x106   :  { %1174 = vmatprep.subr.bf16.mxu1 %v1359_v47 }
 0x107   :  { %1175 = vmatpush3.bf16.msra.mxu1 %v1361_v48 }
 0x108   :  { %1137 = vmatpush3.bf16.msra.mxu0 %v1345_v49  ;;  %1176 = vmatprep.subr.bf16.mxu1 %v1362_v50 }
 0x109   :  { %1138 = vmatprep.subr.bf16.mxu0 %v1346_v51 }
 0x10b   :  { %1177 = vmatpush3.bf16.msra.mxu1 %v1364_v52 }
 0x10c   :  { %1139 = vmatpush3.bf16.msra.mxu0 %v1347_v53  ;;  %1178 = vmatprep.subr.bf16.mxu1 %v1365_v54 }
 0x10d   :  { %1140 = vmatprep.subr.bf16.mxu0 %v1348_v55 }
 0x10f   :  { %1179 = vmatpush3.bf16.msra.mxu1 %v1367_v56 }
 0x110   :  { %1141 = vmatpush3.bf16.msra.mxu0 %v1349_v57  ;;  %1180 = vmatprep.subr.bf16.mxu1 %v1368_v58 }
 0x111   :  { %1142 = vmatprep.subr.bf16.mxu0 %v1350_v59 }
 0x113   :  { %1181 = vmatpush3.bf16.msra.mxu1 %v1370_v60 }
 0x114   :  { %1143 = vmatpush3.bf16.msra.mxu0 %v1351_v61  ;;  %1182 = vmatprep.subr.bf16.mxu1 %v1371_v62 }
 0x115   :  { %1144 = vmatprep.subr.bf16.mxu0 %v1352_v63 }
 0x117   :  { %1183 = vmatpush3.bf16.msra.mxu1 %v1373_v3 }
 0x118   :  { %1145 = vmatpush3.bf16.msra.mxu0 %v1353_v4 }
 0x119   :  { %1286 = vmatprep.subr.bf16.mxu0 %v1357_v6 }
 0x11b   :  { %800 = vmatmul.mubr.bf16.vlgmr.msra.gmra.mrb[16].mxu0 %v1438_v0  ;;  %v1369_v0 = vld [vmem:[%s1716_s3 + $0x120] sm:$0xff]  }
 0x11c   :  { %807 = vmatprep.mubr.bf16.mxu0 %v1523_v18  ;;  %1287 = vmatpush3.bf16.msra.mxu0 %v1357_v6 }
 0x11d   :  { %1288 = vmatprep.subr.bf16.mxu0 %v1360_v7 }
 0x120   :  { %1289 = vmatpush3.bf16.msra.mxu0 %v1360_v7 }
 0x121   :  { %1290 = vmatprep.subr.bf16.mxu0 %v1363_v8 }
 0x123   :  { %808 = vmatmul.mubr.bf16.gmra.mrb[20].mxu0 %v1443_v1  ;;  %v1374_v1 = vld [vmem:[%s1716_s3 + $0xf8] sm:$0xff]  }
 0x124   :  { %815 = vmatprep.mubr.bf16.mxu0 %v1535_v34  ;;  %1291 = vmatpush3.bf16.msra.mxu0 %v1363_v8 }
 0x125   :  { %1292 = vmatprep.subr.bf16.mxu0 %v1366_v9  ;;  %1184 = vmatprep.subr.bf16.mxu1 %v1374_v1 }
 0x126   :  { %1185 = vmatpush3.bf16.msra.mxu1 %v1376_v12 }
 0x127   :  { %1310 = vmatprep.subr.bf16.mxu1 %v1357_v6 }
 0x128   :  { %1293 = vmatpush3.bf16.msra.mxu0 %v1366_v9 }
 0x129   :  { %1294 = vmatprep.subr.bf16.mxu0 %v1369_v0 }
 0x12b   :  { %816 = vmatmul.mubr.bf16.gmra.mrb[24].mxu0 %v1452_v2  ;;  %v1377_v2 = vld [vmem:[%s1716_s3 + $0x138] sm:$0xff]  }
 0x12c   :  { %823 = vmatprep.mubr.bf16.mxu0 %v1529_v30  ;;  %1295 = vmatpush3.bf16.msra.mxu0 %v1369_v0 }
 0x12d   :  { %1296 = vmatprep.subr.bf16.mxu0 %v1372_v10 }
 0x130   :  { %1297 = vmatpush3.bf16.msra.mxu0 %v1372_v10 }
 0x131   :  { %1298 = vmatprep.subr.bf16.mxu0 %v1375_v11 }
 0x133   :  { %824 = vmatmul.mubr.bf16.gmra.mrb[28].mxu0 %v1470_v5 }
 0x134   :  { %1299 = vmatpush3.bf16.msra.mxu0 %v1375_v11 }
 0x135   :  { %1300 = vmatprep.subr.bf16.mxu0 %v1377_v2 }
 0x138   :  { %1301 = vmatpush3.bf16.msra.mxu0 %v1377_v2 }
 0x1ce   :  { %v1264_v5 = vpop.f32.mrb[8].mxu0  ;;  %v1280_v13 = vpop.f32.mrb[8].mxu1 }
 0x1cf   :  { %v315_v14 = vpop.f32.mrb[9].mxu0  ;;  %v388_v15 = vpop.f32.mrb[9].mxu1 }
 0x1d0   :  { %v1265_v16 = vpop.f32.mrb[10].mxu0  ;;  %v1281_v17 = vpop.f32.mrb[10].mxu1 }
 0x1d1   :  { %v347_v18 = vpack.c.bf16 %v1265_v16, %v1264_v5  ;;  %v318_v20 = vpop.f32.mrb[11].mxu0  ;;  %v420_v21 = vpack.c.bf16 %v1281_v17, %v1280_v13  ;;  %v391_v22 = vpop.f32.mrb[11].mxu1 }
 0x1d2   :  { %v346_v23 = vpack.c.bf16 %v318_v20, %v315_v14  ;;  %v419_v24 = vpack.c.bf16 %v391_v22, %v388_v15 }
 0x1d4   :  { %865 = vmatmul.mubr.bf16.vlgmr.msra.gmra.mrb[16].mxu1 %v346_v23  ;;  %1302 = vmatprep.mubr.bf16.mxu0 %v419_v24 }
 0x1d5   :  { %872 = vmatprep.mubr.bf16.mxu1 %v1525_v19  ;;  %1318 = vmatpush3.bf16.msra.mxu1 %v1357_v6 }
 0x1d6   :  { %1311 = vmatprep.subr.bf16.mxu1 %v1360_v7  ;;  %1303 = vmatmul.mubr.bf16.vlgmr.msra.gmra.mrb[32].mxu0 %v420_v21  ;;  %v1268_v25 = vpop.f32.mrb[12].mxu0  ;;  %v1284_v26 = vpop.f32.mrb[12].mxu1 }
 0x1d7   :  { %v331_v27 = vpop.f32.mrb[13].mxu0  ;;  %v404_v28 = vpop.f32.mrb[13].mxu1 }
 0x1d8   :  { %v1269_v29 = vpop.f32.mrb[14].mxu0  ;;  %v1285_v30 = vpop.f32.mrb[14].mxu1 }
 0x1d9   :  { %1319 = vmatpush3.bf16.msra.mxu1 %v1360_v7  ;;  %v349_v32 = vpack.c.bf16 %v1269_v29, %v1268_v25  ;;  %v334_v33 = vpop.f32.mrb[15].mxu0  ;;  %v422_v34 = vpack.c.bf16 %v1285_v30, %v1284_v26  ;;  %v407_v36 = vpop.f32.mrb[15].mxu1 }
 0x1da   :  { %1312 = vmatprep.subr.bf16.mxu1 %v1363_v8  ;;  %v348_v37 = vpack.c.bf16 %v334_v33, %v331_v27  ;;  %v421_v38 = vpack.c.bf16 %v407_v36, %v404_v28 }
 0x1dc   :  { %873 = vmatmul.mubr.bf16.gmra.mrb[20].mxu1 %v347_v18 }
 0x1dd   :  { %880 = vmatprep.mubr.bf16.mxu1 %v1537_v35  ;;  %1320 = vmatpush3.bf16.msra.mxu1 %v1363_v8 }
 0x1de   :  { %1313 = vmatprep.subr.bf16.mxu1 %v1366_v9 }
 0x1e1   :  { %1321 = vmatpush3.bf16.msra.mxu1 %v1366_v9 }
 0x1e2   :  { %1314 = vmatprep.subr.bf16.mxu1 %v1369_v0 }
 0x1e4   :  { %881 = vmatmul.mubr.bf16.gmra.mrb[24].mxu1 %v348_v37 }
 0x1e5   :  { %888 = vmatprep.mubr.bf16.mxu1 %v1531_v31  ;;  %1322 = vmatpush3.bf16.msra.mxu1 %v1369_v0 }
 0x1e6   :  { %1315 = vmatprep.subr.bf16.mxu1 %v1372_v10 }
 0x1e9   :  { %1323 = vmatpush3.bf16.msra.mxu1 %v1372_v10 }
 0x1ea   :  { %1316 = vmatprep.subr.bf16.mxu1 %v1375_v11 }
 0x1ec   :  { %889 = vmatmul.mubr.bf16.gmra.mrb[28].mxu1 %v349_v32 }
 0x1ed   :  { %1324 = vmatpush3.bf16.msra.mxu1 %v1375_v11  ;;  %1306 = vmatprep.mubr.bf16.mxu1 %v421_v38 }
 0x1ee   :  { %1317 = vmatprep.subr.bf16.mxu1 %v1377_v2  ;;  %v1146_v19 = vpop.f32.mrb[16].mxu0 }
 0x1ef   :  { %v1147_v39 = vpop.f32.mrb[17].mxu0 }
 0x1f0   :  { %v1148_v40 = vadd.f32 %v1147_v39, %v1146_v19  ;;  %v1149_v41 = vpop.f32.mrb[18].mxu0 }
 0x1f1   :  { %1325 = vmatpush3.bf16.msra.mxu1 %v1377_v2  ;;  %v1150_v35 = vpop.f32.mrb[19].mxu0 }
 0x1f2   :  { %v1151_v42 = vadd.f32 %v1150_v35, %v1149_v41 }
 0x1f4   :  { %1307 = vmatmul.mubr.bf16.vlgmr.msra.gmra.mrb[32].mxu1 %v422_v34 }
 0x1f6   :  { %v1152_v43 = vpop.f32.mrb[20].mxu0 }
 0x1f7   :  { %v1153_v44 = vpop.f32.mrb[21].mxu0 }
 0x1f8   :  { %v1154_v45 = vadd.f32 %v1153_v44, %v1152_v43  ;;  %v1155_v31 = vpop.f32.mrb[22].mxu0 }
 0x1f9   :  { %v1156_v46 = vpop.f32.mrb[23].mxu0 }
 0x1fa   :  { %v1157_v47 = vadd.f32 %v1156_v46, %v1155_v31 }
 0x1fe   :  { %v1158_v48 = vpop.f32.mrb[24].mxu0 }
 0x1ff   :  { %v1159_v49 = vpop.f32.mrb[25].mxu0 }
 0x200   :  { %v1160_v50 = vadd.f32 %v1159_v49, %v1158_v48  ;;  %v1161_v51 = vpop.f32.mrb[26].mxu0 }
 0x201   :  { %v1162_v52 = vpop.f32.mrb[27].mxu0 }
 0x202   :  { %v1163_v53 = vadd.f32 %v1162_v52, %v1161_v51 }
 0x206   :  { %v1164_v54 = vpop.f32.mrb[28].mxu0 }
 0x207   :  { %v1165_v55 = vpop.f32.mrb[29].mxu0 }
 0x208   :  { %v1166_v56 = vadd.f32 %v1165_v55, %v1164_v54  ;;  %v1167_v57 = vpop.f32.mrb[30].mxu0 }
 0x209   :  { %v1168_v58 = vpop.f32.mrb[31].mxu0 }
 0x20a   :  { %v1169_v59 = vadd.f32 %v1168_v58, %v1167_v57 }
 0x2a7   :  { %v1186_v60 = vpop.f32.mrb[16].mxu1 }
 0x2a8   :  { %v1187_v61 = vpop.f32.mrb[17].mxu1 }
 0x2a9   :  { %v1188_v62 = vadd.f32 %v1187_v61, %v1186_v60  ;;  %v1189_v63 = vpop.f32.mrb[18].mxu1  ;;  %v1304_v3 = vpop.f32.mrb[32].mxu0 }
 0x2aa   :  { %v1190_v4 = vpop.f32.mrb[19].mxu1  ;;  %v931_v6 = vpop.f32.mrb[33].mxu0 }
 0x2ab   :  { %v1191_v7 = vadd.f32 %v1190_v4, %v1189_v63  ;;  %v867_v8 = vadd.f32 %v1188_v62, %v1148_v40  ;;  %v1305_v9 = vpop.f32.mrb[34].mxu0 }
 0x2ac   :  { %v934_v0 = vpop.f32.mrb[35].mxu0 }
 0x2ad   :  { %v932_v10 = vadd.f32 %v931_v6, %v867_v8  ;;  %v870_v1 = vadd.f32 %v1191_v7, %v1151_v42 }
 0x2af   :  { %v1090_v11 = vmul.f32 -1.442695, %v932_v10  ;;  %v935_v12 = vadd.f32 %v934_v0, %v870_v1  ;;  %v1192_v2 = vpop.f32.mrb[20].mxu1 }
 0x2b0   :  { %v1193_v5 = vpop.f32.mrb[21].mxu1 }
 0x2b1   :  { %1378 = vpow2.f32 %v1090_v11  ;;  %v1091_v13 = vmul.f32 -1.442695, %v935_v12  ;;  %v1194_v14 = vadd.f32 %v1193_v5, %v1192_v2  ;;  %v1195_v15 = vpop.f32.mrb[22].mxu1 }
 0x2b2   :  { %v1196_v16 = vpop.f32.mrb[23].mxu1 }
 0x2b3   :  { %1380 = vpow2.f32 %v1091_v13  ;;  %v875_v17 = vadd.f32 %v1194_v14, %v1154_v45  ;;  %v1197_v18 = vadd.f32 %v1196_v16, %v1195_v15 }
 0x2b5   :  { %v940_v20 = vadd.f32 %v1304_v3, %v875_v17  ;;  %v878_v21 = vadd.f32 %v1197_v18, %v1157_v47 }
 0x2b7   :  { %v1092_v22 = vmul.f32 -1.442695, %v940_v20  ;;  %v943_v23 = vadd.f32 %v1305_v9, %v878_v21  ;;  %v1198_v24 = vpop.f32.mrb[24].mxu1 }
 0x2b8   :  { %v1199_v25 = vpop.f32.mrb[25].mxu1 }
 0x2b9   :  { %1382 = vpow2.f32 %v1092_v22  ;;  %v1093_v26 = vmul.f32 -1.442695, %v943_v23  ;;  %v1200_v27 = vadd.f32 %v1199_v25, %v1198_v24  ;;  %v1201_v28 = vpop.f32.mrb[26].mxu1 }
 0x2ba   :  { %v1202_v29 = vpop.f32.mrb[27].mxu1 }
 0x2bb   :  { %v1379_v30 = vpop.eup %1378  ;;  %1384 = vpow2.f32 %v1093_v26  ;;  %v1203_v32 = vadd.f32 %v1202_v29, %v1201_v28  ;;  %v883_v33 = vadd.f32 %v1200_v27, %v1160_v50 }
 0x2bc   :  { %v986_v34 = vadd.f32 1.0, %v1379_v30 }
 0x2bd   :  { %v1381_v36 = vpop.eup %1380  ;;  %v886_v37 = vadd.f32 %v1203_v32, %v1163_v53 }
 0x2be   :  { %1386 = vrcp.f32 %v986_v34  ;;  %v987_v38 = vadd.f32 1.0, %v1381_v36 }
 0x2bf   :  { %v1204_v19 = vpop.f32.mrb[28].mxu1 }
 0x2c0   :  { %1388 = vrcp.f32 %v987_v38  ;;  %v1205_v39 = vpop.f32.mrb[29].mxu1 }
 0x2c1   :  { %v1206_v40 = vadd.f32 %v1205_v39, %v1204_v19  ;;  %v1207_v41 = vpop.f32.mrb[30].mxu1 }
 0x2c2   :  { %v1208_v35 = vpop.f32.mrb[31].mxu1 }
 0x2c3   :  { %v1383_v42 = vpop.eup %1382  ;;  %v1209_v43 = vadd.f32 %v1208_v35, %v1207_v41  ;;  %v891_v44 = vadd.f32 %v1206_v40, %v1166_v56 }
 0x2c4   :  { %v988_v45 = vadd.f32 1.0, %v1383_v42 }
 0x2c5   :  { %v1385_v31 = vpop.eup %1384  ;;  %v894_v46 = vadd.f32 %v1209_v43, %v1169_v59 }
 0x2c6   :  { %1390 = vrcp.f32 %v988_v45  ;;  %v989_v47 = vadd.f32 1.0, %v1385_v31 }
 0x2c7   :  { %v1308_v48 = vpop.f32.mrb[32].mxu1 }
 0x2c8   :  { %v1387_v49 = vpop.eup %1386  ;;  %1392 = vrcp.f32 %v989_v47  ;;  %v956_v50 = vadd.f32 %v1308_v48, %v891_v44  ;;  %v947_v51 = vpop.f32.mrb[33].mxu1 }
 0x2c9   :  { %1010 = vst [vmem:[%s1717_s4] sm:$0xff] %v1387_v49  ;;  %v948_v52 = vadd.f32 %v947_v51, %v883_v33  ;;  %v1309_v53 = vpop.f32.mrb[34].mxu1 }
 0x2ca   :  { %v1389_v54 = vpop.eup %1388  ;;  %v1096_v55 = vmul.f32 -1.442695, %v956_v50  ;;  %v959_v57 = vadd.f32 %v1309_v53, %v894_v46  ;;  %v950_v56 = vpop.f32.mrb[35].mxu1 }
 0x2cb   :  { %1011 = vst [vmem:[%s1717_s4 + $0x8] sm:$0xff] %v1389_v54  ;;  %v1094_v58 = vmul.f32 -1.442695, %v948_v52  ;;  %v951_v59 = vadd.f32 %v950_v56, %v886_v37 }
 0x2cc   :  { %1394 = vpow2.f32 %v1096_v55  ;;  %v1097_v60 = vmul.f32 -1.442695, %v959_v57 }
 0x2cd   :  { %1396 = vpow2.f32 %v1094_v58  ;;  %v1095_v61 = vmul.f32 -1.442695, %v951_v59 }
 0x2ce   :  { %1398 = vpow2.f32 %v1097_v60 }
 0x2cf   :  { %1400 = vpow2.f32 %v1095_v61 }
 0x2d0   :  { %v1391_v62 = vpop.eup %1390 }
 0x2d1   :  { %1012 = vst [vmem:[%s1717_s4 + $0x10] sm:$0xff] %v1391_v62 }
 0x2d2   :  { %v1393_v63 = vpop.eup %1392 }
 0x2d3   :  { %1013 = vst [vmem:[%s1717_s4 + $0x18] sm:$0xff] %v1393_v63 }
 0x2d6   :  { %v1395_v3 = vpop.eup %1394 }
 0x2d7   :  { %v1397_v4 = vpop.eup %1396  ;;  %v992_v6 = vadd.f32 1.0, %v1395_v3 }
 0x2d8   :  { %v1399_v7 = vpop.eup %1398  ;;  %v990_v8 = vadd.f32 1.0, %v1397_v4 }
 0x2d9   :  { %v1401_v9 = vpop.eup %1400  ;;  %1402 = vrcp.f32 %v992_v6  ;;  %v993_v0 = vadd.f32 1.0, %v1399_v7 }
 0x2da   :  { %1404 = vrcp.f32 %v990_v8  ;;  %v991_v10 = vadd.f32 1.0, %v1401_v9 }
 0x2db   :  { %1406 = vrcp.f32 %v993_v0 }
 0x2dc   :  { %1408 = vrcp.f32 %v991_v10 }
 0x2e3   :  { %v1403_v1 = vpop.eup %1402 }
 0x2e4   :  { %v1405_v11 = vpop.eup %1404  ;;  %1016 = vst [vmem:[%s1717_s4 + $0x30] sm:$0xff] %v1403_v1 }
 0x2e5   :  { %v1407_v12 = vpop.eup %1406  ;;  %1014 = vst [vmem:[%s1717_s4 + $0x20] sm:$0xff] %v1405_v11 }
 0x2e6   :  { %v1409_v2 = vpop.eup %1408  ;;  %1017 = vst [vmem:[%s1717_s4 + $0x38] sm:$0xff] %v1407_v12 }
 0x2e7   :  { %1015 = vst [vmem:[%s1717_s4 + $0x28] sm:$0xff] %v1409_v2 }

// kernel: _snn_forward_impl.1
= control target key start
LH: loop header
LB: loop body
LE: loop exit
PB: predicated region body
PF: predicated region fallthrough
CT: control target
= control target key end

     0   :  { %vm90_vm0 = vcmask 523264   ;;  %s1713_s0 = inlined_call_operand.vmem [shape: bf16[64,128], index: 0, kind: input, shape index: {}]   ;;  %s1714_s1 = inlined_call_operand.vmem [shape: bf16[64,64], index: 1, kind: input, shape index: {}]   ;;  %s1715_s2 = inlined_call_operand.vmem [shape: bf16[64,64], index: 2, kind: input, shape index: {}]   ;;  %s1716_s3 = inlined_call_operand.vmem [shape: bf16[640,128], index: 3, kind: input, shape index: {}]   ;;  %s1717_s4 = inlined_call_operand.vmem [shape: f32[64,128], index: 4, kind: output, shape index: {}]  }
   0x1   :  { %v1438_v0 = vld [vmem:[%s1713_s0] sm:$0xff]   ;;  %v1443_v1 = vld [vmem:[%s1713_s0 + $0x8] sm:$0xff]   ;;  %v1452_v2 = vld [vmem:[%s1713_s0 + $0x10] sm:$0xff]  }
   0x2   :  { %1222 = vmatprep.subr.bf16.mxu0 %v1438_v0  ;;  %1238 = vmatprep.subr.bf16.mxu1 %v1438_v0  ;;  %v1330_v3 = vld [vmem:[%s1714_s1] sm:$0xff]   ;;  %v1470_v5 = vld [vmem:[%s1713_s0 + $0x18] sm:$0xff]   ;;  %v1480_v6 = vld [vmem:[%s1714_s1 + $0x8] sm:$0xff]  }
   0x3   :  { %1223 = vmatpush3.bf16.msra.mxu0 %v1438_v0  ;;  %1239 = vmatpush3.bf16.msra.mxu1 %v1438_v0  ;;  %v1331_v4 = vld [vmem:[%s1715_s2] sm:$0xff]   ;;  %v1485_v7 = vld [vmem:[%s1715_s2 + $0x8] sm:$0xff]   ;;  %v1492_v8 = vld [vmem:[%s1714_s1 + $0x10] sm:$0xff]  }
   0x4   :  { %1224 = vmatprep.subr.bf16.mxu0 %v1443_v1  ;;  %1240 = vmatprep.subr.bf16.mxu1 %v1443_v1  ;;  %v1497_v9 = vld [vmem:[%s1715_s2 + $0x10] sm:$0xff]   ;;  %v1510_v10 = vld [vmem:[%s1714_s1 + $0x18] sm:$0xff]   ;;  %v1338_v36 = vld [vmem:[%s1716_s3 + $0x40] sm:$0xff]  }
   0x5   :  { %1230 = vmatprep.mubr.msk.bf16.mxu0 %vm90_vm0, %v1330_v3  ;;  %1246 = vmatprep.mubr.msk.bf16.mxu1 %vm90_vm0, %v1331_v4  ;;  %v1515_v11 = vld [vmem:[%s1715_s2 + $0x18] sm:$0xff]   ;;  %v1354_v37 = vld [vmem:[%s1716_s3 + $0xc0] sm:$0xff]   ;;  %v1340_v39 = vld [vmem:[%s1716_s3 + $0x48] sm:$0xff]  }
   0x6   :  { %v1339_v38 = vld [vmem:[%s1716_s3] sm:$0xff]   ;;  %v1356_v41 = vld [vmem:[%s1716_s3 + $0xc8] sm:$0xff]   ;;  %v1342_v43 = vld [vmem:[%s1716_s3 + $0x50] sm:$0xff]  }
   0x7   :  { %1225 = vmatpush3.bf16.msra.mxu0 %v1443_v1  ;;  %1241 = vmatpush3.bf16.msra.mxu1 %v1443_v1  ;;  %v1355_v40 = vld [vmem:[%s1716_s3 + $0x80] sm:$0xff]   ;;  %v1341_v42 = vld [vmem:[%s1716_s3 + $0x8] sm:$0xff]   ;;  %v1343_v45 = vld [vmem:[%s1716_s3 + $0x10] sm:$0xff]  }
   0x8   :  { %1226 = vmatprep.subr.bf16.mxu0 %v1452_v2  ;;  %1242 = vmatprep.subr.bf16.mxu1 %v1452_v2  ;;  %v1358_v44 = vld [vmem:[%s1716_s3 + $0x88] sm:$0xff]   ;;  %v1344_v46 = vld [vmem:[%s1716_s3 + $0x58] sm:$0xff]   ;;  %v1359_v47 = vld [vmem:[%s1716_s3 + $0xd0] sm:$0xff]  }
   0x9   :  { %v1361_v48 = vld [vmem:[%s1716_s3 + $0x90] sm:$0xff]   ;;  %v1345_v49 = vld [vmem:[%s1716_s3 + $0x18] sm:$0xff]   ;;  %v1346_v51 = vld [vmem:[%s1716_s3 + $0x60] sm:$0xff]  }
   0xa   :  { %v1362_v50 = vld [vmem:[%s1716_s3 + $0xd8] sm:$0xff]   ;;  %v1347_v53 = vld [vmem:[%s1716_s3 + $0x20] sm:$0xff]   ;;  %v1348_v55 = vld [vmem:[%s1716_s3 + $0x68] sm:$0xff]  }
   0xb   :  { %1227 = vmatpush3.bf16.msra.mxu0 %v1452_v2  ;;  %1243 = vmatpush3.bf16.msra.mxu1 %v1452_v2  ;;  %v1364_v52 = vld [vmem:[%s1716_s3 + $0x98] sm:$0xff]   ;;  %v1365_v54 = vld [vmem:[%s1716_s3 + $0xe0] sm:$0xff]   ;;  %v1349_v57 = vld [vmem:[%s1716_s3 + $0x28] sm:$0xff]  }
   0xc   :  { %1228 = vmatprep.subr.bf16.mxu0 %v1470_v5  ;;  %1244 = vmatprep.subr.bf16.mxu1 %v1470_v5  ;;  %v1367_v56 = vld [vmem:[%s1716_s3 + $0xa0] sm:$0xff]   ;;  %v1368_v58 = vld [vmem:[%s1716_s3 + $0xe8] sm:$0xff]   ;;  %v1350_v59 = vld [vmem:[%s1716_s3 + $0x70] sm:$0xff]  }
   0xd   :  { %v1370_v60 = vld [vmem:[%s1716_s3 + $0xa8] sm:$0xff]   ;;  %v1351_v61 = vld [vmem:[%s1716_s3 + $0x30] sm:$0xff]   ;;  %v1352_v63 = vld [vmem:[%s1716_s3 + $0x78] sm:$0xff]  }
   0xe   :  { %v1371_v62 = vld [vmem:[%s1716_s3 + $0xf0] sm:$0xff]  }
   0xf   :  { %1229 = vmatpush3.bf16.msra.mxu0 %v1470_v5  ;;  %1245 = vmatpush3.bf16.msra.mxu1 %v1470_v5 }
  0x12   :  { %1231 = vmatmul.mubr.msk.bf16.vlgmr.msra.gmra.mrb[0].mxu0 %vm90_vm0, %v1480_v6  ;;  %1247 = vmatmul.mubr.msk.bf16.vlgmr.msra.gmra.mrb[0].mxu1 %vm90_vm0, %v1485_v7 }
  0x13   :  { %1234 = vmatprep.mubr.msk.bf16.mxu0 %vm90_vm0, %v1492_v8  ;;  %1250 = vmatprep.mubr.msk.bf16.mxu1 %vm90_vm0, %v1497_v9 }
  0x1a   :  { %1235 = vmatmul.mubr.msk.bf16.gmra.mrb[4].mxu0 %vm90_vm0, %v1510_v10  ;;  %1251 = vmatmul.mubr.msk.bf16.gmra.mrb[4].mxu1 %vm90_vm0, %v1515_v11 }
  0x1b   :  { %1262 = vmatprep.mubr.msk.bf16.mxu0 %vm90_vm0, %v1330_v3  ;;  %1278 = vmatprep.mubr.msk.bf16.mxu1 %vm90_vm0, %v1331_v4  ;;  %v1373_v3 = vld [vmem:[%s1716_s3 + $0xb0] sm:$0xff]   ;;  %v1353_v4 = vld [vmem:[%s1716_s3 + $0x38] sm:$0xff]  }
  0xe5   :  { %v1232_v12 = vpop.f32.mrb[0].mxu0  ;;  %v1248_v13 = vpop.f32.mrb[0].mxu1 }
  0xe6   :  { %v137_v14 = vpop.f32.mrb[1].mxu0  ;;  %v242_v15 = vpop.f32.mrb[1].mxu1 }
  0xe7   :  { %v1233_v16 = vpop.f32.mrb[2].mxu0  ;;  %v1249_v17 = vpop.f32.mrb[2].mxu1 }
  0xe8   :  { %v1523_v18 = vpack.c.bf16 %v1233_v16, %v1232_v12  ;;  %v1525_v19 = vpack.c.bf16 %v1249_v17, %v1248_v13  ;;  %v140_v20 = vpop.f32.mrb[3].mxu0  ;;  %v245_v21 = vpop.f32.mrb[3].mxu1  ;;  %v1376_v12 = vld [vmem:[%s1716_s3 + $0xb8] sm:$0xff]  }
  0xe9   :  { %v168_v22 = vpack.c.bf16 %v140_v20, %v137_v14  ;;  %v273_v23 = vpack.c.bf16 %v245_v21, %v242_v15 }
  0xeb   :  { %1254 = vmatprep.subr.bf16.mxu0 %v168_v22  ;;  %1270 = vmatprep.subr.bf16.mxu1 %v273_v23 }
  0xec   :  { %1255 = vmatpush3.bf16.msra.mxu0 %v168_v22  ;;  %1271 = vmatpush3.bf16.msra.mxu1 %v273_v23 }
  0xed   :  { %v1236_v24 = vpop.f32.mrb[4].mxu0  ;;  %v1252_v25 = vpop.f32.mrb[4].mxu1  ;;  %1256 = vmatprep.subr.bf16.mxu0 %v1523_v18  ;;  %1272 = vmatprep.subr.bf16.mxu1 %v1525_v19 }
  0xee   :  { %v153_v26 = vpop.f32.mrb[5].mxu0  ;;  %v258_v27 = vpop.f32.mrb[5].mxu1 }
  0xef   :  { %v1237_v28 = vpop.f32.mrb[6].mxu0  ;;  %v1253_v29 = vpop.f32.mrb[6].mxu1 }
  0xf0   :  { %v1529_v30 = vpack.c.bf16 %v1237_v28, %v1236_v24  ;;  %v1531_v31 = vpack.c.bf16 %v1253_v29, %v1252_v25  ;;  %v156_v32 = vpop.f32.mrb[7].mxu0  ;;  %v261_v33 = vpop.f32.mrb[7].mxu1  ;;  %1257 = vmatpush3.bf16.msra.mxu0 %v1523_v18  ;;  %1273 = vmatpush3.bf16.msra.mxu1 %v1525_v19 }
  0xf1   :  { %v1535_v34 = vpack.c.bf16 %v156_v32, %v153_v26  ;;  %v1537_v35 = vpack.c.bf16 %v261_v33, %v258_v27 }
  0xf3   :  { %1258 = vmatprep.subr.bf16.mxu0 %v1535_v34  ;;  %1274 = vmatprep.subr.bf16.mxu1 %v1537_v35 }
  0xf4   :  { %1259 = vmatpush3.bf16.msra.mxu0 %v1535_v34  ;;  %1275 = vmatpush3.bf16.msra.mxu1 %v1537_v35 }
  0xf5   :  { %1260 = vmatprep.subr.bf16.mxu0 %v1529_v30  ;;  %1276 = vmatprep.subr.bf16.mxu1 %v1531_v31 }
  0xf8   :  { %1261 = vmatpush3.bf16.msra.mxu0 %v1529_v30  ;;  %1277 = vmatpush3.bf16.msra.mxu1 %v1531_v31 }
  0xf9   :  { %1130 = vmatprep.subr.bf16.mxu0 %v1338_v36  ;;  %1170 = vmatprep.subr.bf16.mxu1 %v1354_v37 }
  0xfb   :  { %1263 = vmatmul.mubr.msk.bf16.vlgmr.msra.gmra.mrb[8].mxu0 %vm90_vm0, %v1480_v6  ;;  %1279 = vmatmul.mubr.msk.bf16.vlgmr.msra.gmra.mrb[8].mxu1 %vm90_vm0, %v1485_v7  ;;  %v1357_v6 = vld [vmem:[%s1716_s3 + $0x100] sm:$0xff]   ;;  %v1360_v7 = vld [vmem:[%s1716_s3 + $0x108] sm:$0xff]  }
  0xfc   :  { %1131 = vmatpush3.bf16.msra.mxu0 %v1339_v38  ;;  %1266 = vmatprep.mubr.msk.bf16.mxu0 %vm90_vm0, %v1492_v8  ;;  %v1363_v8 = vld [vmem:[%s1716_s3 + $0x110] sm:$0xff]  }
  0xfd   :  { %1132 = vmatprep.subr.bf16.mxu0 %v1340_v39  ;;  %1282 = vmatprep.mubr.msk.bf16.mxu1 %vm90_vm0, %v1497_v9  ;;  %v1366_v9 = vld [vmem:[%s1716_s3 + $0x118] sm:$0xff]  }
  0xfe   :  { %1171 = vmatpush3.bf16.msra.mxu1 %v1355_v40 }
  0xff   :  { %1172 = vmatprep.subr.bf16.mxu1 %v1356_v41 }
 0x100   :  { %1133 = vmatpush3.bf16.msra.mxu0 %v1341_v42 }
 0x101   :  { %1134 = vmatprep.subr.bf16.mxu0 %v1342_v43 }
 0x102   :  { %1173 = vmatpush3.bf16.msra.mxu1 %v1358_v44 }
 0x103   :  { %1267 = vmatmul.mubr.msk.bf16.gmra.mrb[12].mxu0 %vm90_vm0, %v1510_v10  ;;  %1283 = vmatmul.mubr.msk.bf16.gmra.mrb[12].mxu1 %vm90_vm0, %v1515_v11  ;;  %v1372_v10 = vld [vmem:[%s1716_s3 + $0x128] sm:$0xff]   ;;  %v1375_v11 = vld [vmem:[%s1716_s3 + $0x130] sm:$0xff]  }
 0x104   :  { %1135 = vmatpush3.bf16.msra.mxu0 %v1343_v45  ;;  %799 = vmatprep.mubr.bf16.mxu0 %v168_v22 }
 0x105   :  { %864 = vmatprep.mubr.bf16.mxu1 %v273_v23  ;;  %1136 = vmatprep.subr.bf16.mxu0 %v1344_v46 }
 0x106   :  { %1174 = vmatprep.subr.bf16.mxu1 %v1359_v47 }
 0x107   :  { %1175 = vmatpush3.bf16.msra.mxu1 %v1361_v48 }
 0x108   :  { %1137 = vmatpush3.bf16.msra.mxu0 %v1345_v49  ;;  %1176 = vmatprep.subr.bf16.mxu1 %v1362_v50 }
 0x109   :  { %1138 = vmatprep.subr.bf16.mxu0 %v1346_v51 }
 0x10b   :  { %1177 = vmatpush3.bf16.msra.mxu1 %v1364_v52 }
 0x10c   :  { %1139 = vmatpush3.bf16.msra.mxu0 %v1347_v53  ;;  %1178 = vmatprep.subr.bf16.mxu1 %v1365_v54 }
 0x10d   :  { %1140 = vmatprep.subr.bf16.mxu0 %v1348_v55 }
 0x10f   :  { %1179 = vmatpush3.bf16.msra.mxu1 %v1367_v56 }
 0x110   :  { %1141 = vmatpush3.bf16.msra.mxu0 %v1349_v57  ;;  %1180 = vmatprep.subr.bf16.mxu1 %v1368_v58 }
 0x111   :  { %1142 = vmatprep.subr.bf16.mxu0 %v1350_v59 }
 0x113   :  { %1181 = vmatpush3.bf16.msra.mxu1 %v1370_v60 }
 0x114   :  { %1143 = vmatpush3.bf16.msra.mxu0 %v1351_v61  ;;  %1182 = vmatprep.subr.bf16.mxu1 %v1371_v62 }
 0x115   :  { %1144 = vmatprep.subr.bf16.mxu0 %v1352_v63 }
 0x117   :  { %1183 = vmatpush3.bf16.msra.mxu1 %v1373_v3 }
 0x118   :  { %1145 = vmatpush3.bf16.msra.mxu0 %v1353_v4 }
 0x119   :  { %1286 = vmatprep.subr.bf16.mxu0 %v1357_v6 }
 0x11b   :  { %800 = vmatmul.mubr.bf16.vlgmr.msra.gmra.mrb[16].mxu0 %v1438_v0  ;;  %v1369_v0 = vld [vmem:[%s1716_s3 + $0x120] sm:$0xff]  }
 0x11c   :  { %807 = vmatprep.mubr.bf16.mxu0 %v1523_v18  ;;  %1287 = vmatpush3.bf16.msra.mxu0 %v1357_v6 }
 0x11d   :  { %1288 = vmatprep.subr.bf16.mxu0 %v1360_v7 }
 0x120   :  { %1289 = vmatpush3.bf16.msra.mxu0 %v1360_v7 }
 0x121   :  { %1290 = vmatprep.subr.bf16.mxu0 %v1363_v8 }
 0x123   :  { %808 = vmatmul.mubr.bf16.gmra.mrb[20].mxu0 %v1443_v1  ;;  %v1374_v1 = vld [vmem:[%s1716_s3 + $0xf8] sm:$0xff]  }
 0x124   :  { %815 = vmatprep.mubr.bf16.mxu0 %v1535_v34  ;;  %1291 = vmatpush3.bf16.msra.mxu0 %v1363_v8 }
 0x125   :  { %1292 = vmatprep.subr.bf16.mxu0 %v1366_v9  ;;  %1184 = vmatprep.subr.bf16.mxu1 %v1374_v1 }
 0x126   :  { %1185 = vmatpush3.bf16.msra.mxu1 %v1376_v12 }
 0x127   :  { %1310 = vmatprep.subr.bf16.mxu1 %v1357_v6 }
 0x128   :  { %1293 = vmatpush3.bf16.msra.mxu0 %v1366_v9 }
 0x129   :  { %1294 = vmatprep.subr.bf16.mxu0 %v1369_v0 }
 0x12b   :  { %816 = vmatmul.mubr.bf16.gmra.mrb[24].mxu0 %v1452_v2  ;;  %v1377_v2 = vld [vmem:[%s1716_s3 + $0x138] sm:$0xff]  }
 0x12c   :  { %823 = vmatprep.mubr.bf16.mxu0 %v1529_v30  ;;  %1295 = vmatpush3.bf16.msra.mxu0 %v1369_v0 }
 0x12d   :  { %1296 = vmatprep.subr.bf16.mxu0 %v1372_v10 }
 0x130   :  { %1297 = vmatpush3.bf16.msra.mxu0 %v1372_v10 }
 0x131   :  { %1298 = vmatprep.subr.bf16.mxu0 %v1375_v11 }
 0x133   :  { %824 = vmatmul.mubr.bf16.gmra.mrb[28].mxu0 %v1470_v5 }
 0x134   :  { %1299 = vmatpush3.bf16.msra.mxu0 %v1375_v11 }
 0x135   :  { %1300 = vmatprep.subr.bf16.mxu0 %v1377_v2 }
 0x138   :  { %1301 = vmatpush3.bf16.msra.mxu0 %v1377_v2 }
 0x1ce   :  { %v1264_v5 = vpop.f32.mrb[8].mxu0  ;;  %v1280_v13 = vpop.f32.mrb[8].mxu1 }
 0x1cf   :  { %v315_v14 = vpop.f32.mrb[9].mxu0  ;;  %v388_v15 = vpop.f32.mrb[9].mxu1 }
 0x1d0   :  { %v1265_v16 = vpop.f32.mrb[10].mxu0  ;;  %v1281_v17 = vpop.f32.mrb[10].mxu1 }
 0x1d1   :  { %v347_v18 = vpack.c.bf16 %v1265_v16, %v1264_v5  ;;  %v318_v20 = vpop.f32.mrb[11].mxu0  ;;  %v420_v21 = vpack.c.bf16 %v1281_v17, %v1280_v13  ;;  %v391_v22 = vpop.f32.mrb[11].mxu1 }
 0x1d2   :  { %v346_v23 = vpack.c.bf16 %v318_v20, %v315_v14  ;;  %v419_v24 = vpack.c.bf16 %v391_v22, %v388_v15 }
 0x1d4   :  { %865 = vmatmul.mubr.bf16.vlgmr.msra.gmra.mrb[16].mxu1 %v346_v23  ;;  %1302 = vmatprep.mubr.bf16.mxu0 %v419_v24 }
 0x1d5   :  { %872 = vmatprep.mubr.bf16.mxu1 %v1525_v19  ;;  %1318 = vmatpush3.bf16.msra.mxu1 %v1357_v6 }
 0x1d6   :  { %1311 = vmatprep.subr.bf16.mxu1 %v1360_v7  ;;  %1303 = vmatmul.mubr.bf16.vlgmr.msra.gmra.mrb[32].mxu0 %v420_v21  ;;  %v1268_v25 = vpop.f32.mrb[12].mxu0  ;;  %v1284_v26 = vpop.f32.mrb[12].mxu1 }
 0x1d7   :  { %v331_v27 = vpop.f32.mrb[13].mxu0  ;;  %v404_v28 = vpop.f32.mrb[13].mxu1 }
 0x1d8   :  { %v1269_v29 = vpop.f32.mrb[14].mxu0  ;;  %v1285_v30 = vpop.f32.mrb[14].mxu1 }
 0x1d9   :  { %1319 = vmatpush3.bf16.msra.mxu1 %v1360_v7  ;;  %v349_v32 = vpack.c.bf16 %v1269_v29, %v1268_v25  ;;  %v334_v33 = vpop.f32.mrb[15].mxu0  ;;  %v422_v34 = vpack.c.bf16 %v1285_v30, %v1284_v26  ;;  %v407_v36 = vpop.f32.mrb[15].mxu1 }
 0x1da   :  { %1312 = vmatprep.subr.bf16.mxu1 %v1363_v8  ;;  %v348_v37 = vpack.c.bf16 %v334_v33, %v331_v27  ;;  %v421_v38 = vpack.c.bf16 %v407_v36, %v404_v28 }
 0x1dc   :  { %873 = vmatmul.mubr.bf16.gmra.mrb[20].mxu1 %v347_v18 }
 0x1dd   :  { %880 = vmatprep.mubr.bf16.mxu1 %v1537_v35  ;;  %1320 = vmatpush3.bf16.msra.mxu1 %v1363_v8 }
 0x1de   :  { %1313 = vmatprep.subr.bf16.mxu1 %v1366_v9 }
 0x1e1   :  { %1321 = vmatpush3.bf16.msra.mxu1 %v1366_v9 }
 0x1e2   :  { %1314 = vmatprep.subr.bf16.mxu1 %v1369_v0 }
 0x1e4   :  { %881 = vmatmul.mubr.bf16.gmra.mrb[24].mxu1 %v348_v37 }
 0x1e5   :  { %888 = vmatprep.mubr.bf16.mxu1 %v1531_v31  ;;  %1322 = vmatpush3.bf16.msra.mxu1 %v1369_v0 }
 0x1e6   :  { %1315 = vmatprep.subr.bf16.mxu1 %v1372_v10 }
 0x1e9   :  { %1323 = vmatpush3.bf16.msra.mxu1 %v1372_v10 }
 0x1ea   :  { %1316 = vmatprep.subr.bf16.mxu1 %v1375_v11 }
 0x1ec   :  { %889 = vmatmul.mubr.bf16.gmra.mrb[28].mxu1 %v349_v32 }
 0x1ed   :  { %1324 = vmatpush3.bf16.msra.mxu1 %v1375_v11  ;;  %1306 = vmatprep.mubr.bf16.mxu1 %v421_v38 }
 0x1ee   :  { %1317 = vmatprep.subr.bf16.mxu1 %v1377_v2  ;;  %v1146_v19 = vpop.f32.mrb[16].mxu0 }
 0x1ef   :  { %v1147_v39 = vpop.f32.mrb[17].mxu0 }
 0x1f0   :  { %v1148_v40 = vadd.f32 %v1147_v39, %v1146_v19  ;;  %v1149_v41 = vpop.f32.mrb[18].mxu0 }
 0x1f1   :  { %1325 = vmatpush3.bf16.msra.mxu1 %v1377_v2  ;;  %v1150_v35 = vpop.f32.mrb[19].mxu0 }
 0x1f2   :  { %v1151_v42 = vadd.f32 %v1150_v35, %v1149_v41 }
 0x1f4   :  { %1307 = vmatmul.mubr.bf16.vlgmr.msra.gmra.mrb[32].mxu1 %v422_v34 }
 0x1f6   :  { %v1152_v43 = vpop.f32.mrb[20].mxu0 }
 0x1f7   :  { %v1153_v44 = vpop.f32.mrb[21].mxu0 }
 0x1f8   :  { %v1154_v45 = vadd.f32 %v1153_v44, %v1152_v43  ;;  %v1155_v31 = vpop.f32.mrb[22].mxu0 }
 0x1f9   :  { %v1156_v46 = vpop.f32.mrb[23].mxu0 }
 0x1fa   :  { %v1157_v47 = vadd.f32 %v1156_v46, %v1155_v31 }
 0x1fe   :  { %v1158_v48 = vpop.f32.mrb[24].mxu0 }
 0x1ff   :  { %v1159_v49 = vpop.f32.mrb[25].mxu0 }
 0x200   :  { %v1160_v50 = vadd.f32 %v1159_v49, %v1158_v48  ;;  %v1161_v51 = vpop.f32.mrb[26].mxu0 }
 0x201   :  { %v1162_v52 = vpop.f32.mrb[27].mxu0 }
 0x202   :  { %v1163_v53 = vadd.f32 %v1162_v52, %v1161_v51 }
 0x206   :  { %v1164_v54 = vpop.f32.mrb[28].mxu0 }
 0x207   :  { %v1165_v55 = vpop.f32.mrb[29].mxu0 }
 0x208   :  { %v1166_v56 = vadd.f32 %v1165_v55, %v1164_v54  ;;  %v1167_v57 = vpop.f32.mrb[30].mxu0 }
 0x209   :  { %v1168_v58 = vpop.f32.mrb[31].mxu0 }
 0x20a   :  { %v1169_v59 = vadd.f32 %v1168_v58, %v1167_v57 }
 0x2a7   :  { %v1186_v60 = vpop.f32.mrb[16].mxu1 }
 0x2a8   :  { %v1187_v61 = vpop.f32.mrb[17].mxu1 }
 0x2a9   :  { %v1188_v62 = vadd.f32 %v1187_v61, %v1186_v60  ;;  %v1189_v63 = vpop.f32.mrb[18].mxu1  ;;  %v1304_v3 = vpop.f32.mrb[32].mxu0 }
 0x2aa   :  { %v1190_v4 = vpop.f32.mrb[19].mxu1  ;;  %v931_v6 = vpop.f32.mrb[33].mxu0 }
 0x2ab   :  { %v1191_v7 = vadd.f32 %v1190_v4, %v1189_v63  ;;  %v867_v8 = vadd.f32 %v1188_v62, %v1148_v40  ;;  %v1305_v9 = vpop.f32.mrb[34].mxu0 }
 0x2ac   :  { %v934_v0 = vpop.f32.mrb[35].mxu0 }
 0x2ad   :  { %v932_v10 = vadd.f32 %v931_v6, %v867_v8  ;;  %v870_v1 = vadd.f32 %v1191_v7, %v1151_v42 }
 0x2af   :  { %v1090_v11 = vmul.f32 -1.442695, %v932_v10  ;;  %v935_v12 = vadd.f32 %v934_v0, %v870_v1  ;;  %v1192_v2 = vpop.f32.mrb[20].mxu1 }
 0x2b0   :  { %v1193_v5 = vpop.f32.mrb[21].mxu1 }
 0x2b1   :  { %1378 = vpow2.f32 %v1090_v11  ;;  %v1091_v13 = vmul.f32 -1.442695, %v935_v12  ;;  %v1194_v14 = vadd.f32 %v1193_v5, %v1192_v2  ;;  %v1195_v15 = vpop.f32.mrb[22].mxu1 }
 0x2b2   :  { %v1196_v16 = vpop.f32.mrb[23].mxu1 }
 0x2b3   :  { %1380 = vpow2.f32 %v1091_v13  ;;  %v875_v17 = vadd.f32 %v1194_v14, %v1154_v45  ;;  %v1197_v18 = vadd.f32 %v1196_v16, %v1195_v15 }
 0x2b5   :  { %v940_v20 = vadd.f32 %v1304_v3, %v875_v17  ;;  %v878_v21 = vadd.f32 %v1197_v18, %v1157_v47 }
 0x2b7   :  { %v1092_v22 = vmul.f32 -1.442695, %v940_v20  ;;  %v943_v23 = vadd.f32 %v1305_v9, %v878_v21  ;;  %v1198_v24 = vpop.f32.mrb[24].mxu1 }
 0x2b8   :  { %v1199_v25 = vpop.f32.mrb[25].mxu1 }
 0x2b9   :  { %1382 = vpow2.f32 %v1092_v22  ;;  %v1093_v26 = vmul.f32 -1.442695, %v943_v23  ;;  %v1200_v27 = vadd.f32 %v1199_v25, %v1198_v24  ;;  %v1201_v28 = vpop.f32.mrb[26].mxu1 }
 0x2ba   :  { %v1202_v29 = vpop.f32.mrb[27].mxu1 }
 0x2bb   :  { %v1379_v30 = vpop.eup %1378  ;;  %1384 = vpow2.f32 %v1093_v26  ;;  %v1203_v32 = vadd.f32 %v1202_v29, %v1201_v28  ;;  %v883_v33 = vadd.f32 %v1200_v27, %v1160_v50 }
 0x2bc   :  { %v986_v34 = vadd.f32 1.0, %v1379_v30 }
 0x2bd   :  { %v1381_v36 = vpop.eup %1380  ;;  %v886_v37 = vadd.f32 %v1203_v32, %v1163_v53 }
 0x2be   :  { %1386 = vrcp.f32 %v986_v34  ;;  %v987_v38 = vadd.f32 1.0, %v1381_v36 }
 0x2bf   :  { %v1204_v19 = vpop.f32.mrb[28].mxu1 }
 0x2c0   :  { %1388 = vrcp.f32 %v987_v38  ;;  %v1205_v39 = vpop.f32.mrb[29].mxu1 }
 0x2c1   :  { %v1206_v40 = vadd.f32 %v1205_v39, %v1204_v19  ;;  %v1207_v41 = vpop.f32.mrb[30].mxu1 }
 0x2c2   :  { %v1208_v35 = vpop.f32.mrb[31].mxu1 }
 0x2c3   :  { %v1383_v42 = vpop.eup %1382  ;;  %v1209_v43 = vadd.f32 %v1208_v35, %v1207_v41  ;;  %v891_v44 = vadd.f32 %v1206_v40, %v1166_v56 }
 0x2c4   :  { %v988_v45 = vadd.f32 1.0, %v1383_v42 }
 0x2c5   :  { %v1385_v31 = vpop.eup %1384  ;;  %v894_v46 = vadd.f32 %v1209_v43, %v1169_v59 }
 0x2c6   :  { %1390 = vrcp.f32 %v988_v45  ;;  %v989_v47 = vadd.f32 1.0, %v1385_v31 }
 0x2c7   :  { %v1308_v48 = vpop.f32.mrb[32].mxu1 }
 0x2c8   :  { %v1387_v49 = vpop.eup %1386  ;;  %1392 = vrcp.f32 %v989_v47  ;;  %v956_v50 = vadd.f32 %v1308_v48, %v891_v44  ;;  %v947_v51 = vpop.f32.mrb[33].mxu1 }
 0x2c9   :  { %1010 = vst [vmem:[%s1717_s4] sm:$0xff] %v1387_v49  ;;  %v948_v52 = vadd.f32 %v947_v51, %v883_v33  ;;  %v1309_v53 = vpop.f32.mrb[34].mxu1 }
 0x2ca   :  { %v1389_v54 = vpop.eup %1388  ;;  %v1096_v55 = vmul.f32 -1.442695, %v956_v50  ;;  %v959_v57 = vadd.f32 %v1309_v53, %v894_v46  ;;  %v950_v56 = vpop.f32.mrb[35].mxu1 }
 0x2cb   :  { %1011 = vst [vmem:[%s1717_s4 + $0x8] sm:$0xff] %v1389_v54  ;;  %v1094_v58 = vmul.f32 -1.442695, %v948_v52  ;;  %v951_v59 = vadd.f32 %v950_v56, %v886_v37 }
 0x2cc   :  { %1394 = vpow2.f32 %v1096_v55  ;;  %v1097_v60 = vmul.f32 -1.442695, %v959_v57 }
 0x2cd   :  { %1396 = vpow2.f32 %v1094_v58  ;;  %v1095_v61 = vmul.f32 -1.442695, %v951_v59 }
 0x2ce   :  { %1398 = vpow2.f32 %v1097_v60 }
 0x2cf   :  { %1400 = vpow2.f32 %v1095_v61 }
 0x2d0   :  { %v1391_v62 = vpop.eup %1390 }
 0x2d1   :  { %1012 = vst [vmem:[%s1717_s4 + $0x10] sm:$0xff] %v1391_v62 }
 0x2d2   :  { %v1393_v63 = vpop.eup %1392 }
 0x2d3   :  { %1013 = vst [vmem:[%s1717_s4 + $0x18] sm:$0xff] %v1393_v63 }
 0x2d6   :  { %v1395_v3 = vpop.eup %1394 }
 0x2d7   :  { %v1397_v4 = vpop.eup %1396  ;;  %v992_v6 = vadd.f32 1.0, %v1395_v3 }
 0x2d8   :  { %v1399_v7 = vpop.eup %1398  ;;  %v990_v8 = vadd.f32 1.0, %v1397_v4 }
 0x2d9   :  { %v1401_v9 = vpop.eup %1400  ;;  %1402 = vrcp.f32 %v992_v6  ;;  %v993_v0 = vadd.f32 1.0, %v1399_v7 }
 0x2da   :  { %1404 = vrcp.f32 %v990_v8  ;;  %v991_v10 = vadd.f32 1.0, %v1401_v9 }
 0x2db   :  { %1406 = vrcp.f32 %v993_v0 }
 0x2dc   :  { %1408 = vrcp.f32 %v991_v10 }
 0x2e3   :  { %v1403_v1 = vpop.eup %1402 }
 0x2e4   :  { %v1405_v11 = vpop.eup %1404  ;;  %1016 = vst [vmem:[%s1717_s4 + $0x30] sm:$0xff] %v1403_v1 }
 0x2e5   :  { %v1407_v12 = vpop.eup %1406  ;;  %1014 = vst [vmem:[%s1717_s4 + $0x20] sm:$0xff] %v1405_v11 }
 0x2e6   :  { %v1409_v2 = vpop.eup %1408  ;;  %1017 = vst [vmem:[%s1717_s4 + $0x38] sm:$0xff] %v1407_v12 }
 0x2e7   :  { %1015 = vst [vmem:[%s1717_s4 + $0x28] sm:$0xff] %v1409_v2 }

</bundles_post_ra>
